<compile_context>
chip_gen: v6e
topology: v6e:2x2x1
jax: 0.10.0
libtpu: 0.0.40
codegen_flags: <defaults>
</compile_context>

<pallas_src>
import math

import jax
import jax.numpy as jnp
from jax.experimental import pallas as pl
from jax.experimental.pallas import tpu as pltpu

LANE = 128
SUBLANE = 8


def _round_up(x, m):
    return ((x + m - 1) // m) * m


def _pad2d(a, rows, cols):
    r, c = a.shape
    return jnp.pad(a, ((0, rows - r), (0, cols - c)))


def _softplus(x):
    # Matches torch.nn.Softplus (beta=1, threshold=20) without relying on log1p lowering.
    return jnp.where(x > 20.0, x, jnp.log(1.0 + jnp.exp(jnp.minimum(x, 20.0))))


def _init_mlp(key, dims, dtype=jnp.float32):
    """nn.Linear-style init: U(-1/sqrt(fan_in), 1/sqrt(fan_in)); weights stored (in, out)."""
    params = []
    keys = jax.random.split(key, len(dims) - 1)
    for k, (din, dout) in zip(keys, zip(dims[:-1], dims[1:])):
        kw, kb = jax.random.split(k)
        bound = 1.0 / math.sqrt(din)
        w = jax.random.uniform(kw, (din, dout), dtype, minval=-bound, maxval=bound)
        b = jax.random.uniform(kb, (dout,), dtype, minval=-bound, maxval=bound)
        params.append((w, b))
    return params


def _fold_input_standardization(w, b, mean, std):
    # ((x - mean)/std) @ W + b  ==  x @ (W/std[:,None]) + (b - (mean/std) @ W)
    inv = 1.0 / std
    return w * inv[:, None], b - (mean * inv) @ w


def _fold_output_unstandardization(w, b, mean, std):
    # (h @ W + b) * std + mean  ==  h @ (W*std[None,:]) + (b*std + mean)
    return w * std[None, :], b * std + mean


class CondNoiseMLPPallas:
    """JAX/Pallas port of CondNoiseMLP's forward pass (inv_masses branch left as TODO)."""

    def __init__(self, input_dim, output_dim, hidden_layer_dims, stoch, key,
                 input_stats=None, output_stats=None, output_raw=False,
                 sigma_fun='exp', matmul_dtype=jnp.float32, batch_tile=512):
        assert sigma_fun in ('exp', 'softplus')
        self.input_dim = int(input_dim)
        self.output_dim = int(output_dim)
        self.noise_dim = int(output_dim)
        self.hidden_layer_dims = list(hidden_layer_dims)
        self.stoch = bool(stoch)
        self.sigma_fun = sigma_fun
        self.output_raw = bool(output_raw)
        self.matmul_dtype = matmul_dtype
        self.batch_tile = int(batch_tile)
        self.input_stats = None if input_stats is None else jnp.asarray(input_stats, jnp.float32)
        self.output_stats = None if output_stats is None else jnp.asarray(output_stats, jnp.float32)

        k_out, k_noise = jax.random.split(key)
        if self.stoch:
            out_dims = [self.input_dim + self.noise_dim, *self.hidden_layer_dims, self.output_dim]
            noise_dims = [self.input_dim, *reversed(self.hidden_layer_dims), 2 * self.output_dim]
            self._raw_noise = _init_mlp(k_noise, noise_dims)
            # torch: final bias of cond_noise_nn is filled with 1.0
            w_last, b_last = self._raw_noise[-1]
            self._raw_noise[-1] = (w_last, jnp.ones_like(b_last))
        else:
            out_dims = [self.input_dim, *self.hidden_layer_dims, self.output_dim]
            self._raw_noise = []
        self._raw_out = _init_mlp(k_out, out_dims)

        self._build_kernel_params()
        self._kernel = self._make_kernel()

    # ------------------------------------------------------------------ params
    def _build_kernel_params(self):
        self.dp_in = _round_up(self.input_dim, LANE)
        self.dp_noise = _round_up(self.noise_dim, LANE)
        self.dp_out = _round_up(self.output_dim, LANE)
        mmd = self.matmul_dtype

        in_mean = in_std = None
        if self.input_stats is not None:
            in_mean, in_std = self.input_stats[0], self.input_stats[1]

        def pad_w(w):
            return _pad2d(w, _round_up(w.shape[0], LANE), _round_up(w.shape[1], LANE)).astype(mmd)

        def pad_b(b):
            return jnp.pad(b, (0, _round_up(b.shape[0], LANE) - b.shape[0])).reshape(1, -1).astype(jnp.float32)

        # ---- conditional-noise net (mean / logsigma heads split in the wrapper) ----
        noise_flat = []
        if self.stoch:
            layers = list(self._raw_noise)
            if in_mean is not None:
                layers[0] = _fold_input_standardization(*layers[0], in_mean, in_std)
            for w, b in layers[:-1]:
                noise_flat += [pad_w(w), pad_b(b)]
            w_last, b_last = layers[-1]
            nd = self.noise_dim
            noise_flat += [pad_w(w_last[:, :nd]), pad_b(b_last[:nd]),
                           pad_w(w_last[:, nd:]), pad_b(b_last[nd:])]
        self._noise_params = noise_flat

        # ---- output net (first layer split into x-part / eps-part for stoch) ----
        out_layers = list(self._raw_out)
        if self.output_raw and self.output_stats is not None:
            out_layers[-1] = _fold_output_unstandardization(
                *out_layers[-1], self.output_stats[0], self.output_stats[1])

        out_flat = []
        if self.stoch:
            w1, b1 = out_layers[0]
            wx, we = w1[:self.input_dim], w1[self.input_dim:]
            if in_mean is not None:
                wx, b1 = _fold_input_standardization(wx, b1, in_mean, in_std)
            out_flat += [pad_w(wx), pad_w(we), pad_b(b1)]
            rest = out_layers[1:]
        else:
            rest = out_layers
            if in_mean is not None and rest:
                rest[0] = _fold_input_standardization(*rest[0], in_mean, in_std)
        for w, b in rest:
            out_flat += [pad_w(w), pad_b(b)]
        self._out_params = out_flat

        self._n_out_layers = len(out_layers)
        self._n_noise_hidden = max(len(self._raw_noise) - 1, 0)

        all_params = self._noise_params + self._out_params
        self._flops_per_row = 2 * sum(int(p.shape[0]) * int(p.shape[1])
                                      for p in all_params if p.shape[0] > 1)
        self._param_bytes = sum(int(p.size) * p.dtype.itemsize for p in all_params)

    # ------------------------------------------------------------------ kernel
    def _make_kernel(self):
        stoch = self.stoch
        n_noise_hidden = self._n_noise_hidden
        n_out_layers = self._n_out_layers
        sigma_exp = (self.sigma_fun == 'exp')
        mmd = self.matmul_dtype

        def dense(a, w_ref, b_ref):
            # MXU matmul (f32 accumulation) + f32 bias add.
            return jnp.dot(a.astype(mmd), w_ref[...],
                           preferred_element_type=jnp.float32) + b_ref[...]

        def kernel(*refs):
            out_ref = refs[-1]
            it = iter(refs[:-1])
            x = next(it)[...].astype(jnp.float32)

            if stoch:
                eps = next(it)[...].astype(jnp.float32)
                # cond_noise_nn: hidden ReLU layers then (mean, logsigma) heads.
                h = x
                for _ in range(n_noise_hidden):
                    h = jnp.maximum(dense(h, next(it), next(it)), 0.0)
                mean = dense(h, next(it), next(it))
                logsig = dense(h, next(it), next(it))
                sigma = jnp.exp(logsig) if sigma_exp else _softplus(logsig)
                eps_s = mean + eps * sigma
                # output_nn first layer on concat([x, eps_s]) == x@Wx + eps_s@We + b.
                wx, we, b1 = next(it), next(it), next(it)
                a = (jnp.dot(x.astype(mmd), wx[...], preferred_element_type=jnp.float32)
                     + jnp.dot(eps_s.astype(mmd), we[...], preferred_element_type=jnp.float32)
                     + b1[...])
                if n_out_layers > 1:
                    a = jnp.maximum(a, 0.0)
                start = 1
            else:
                a = x
                start = 0

            for layer in range(start, n_out_layers):
                a = dense(a, next(it), next(it))
                if layer < n_out_layers - 1:
                    a = jnp.maximum(a, 0.0)

            out_ref[...] = a.astype(out_ref.dtype)

        return kernel

    # ------------------------------------------------------------------ forward
    def _pick_batch_tile(self, batch):
        tb = min(self.batch_tile, batch)
        # Ensure >=2 parallel grid steps when batch allows, so the v7x megacore (2 TCs) is busy.
        if tb == batch and batch >= 2 * SUBLANE:
            tb = _round_up(pl.cdiv(batch, 2), SUBLANE)
        return tb

    def __call__(self, x, key=None):
        x = jnp.asarray(x, jnp.float32)
        batch, d = x.shape
        assert d == self.input_dim

        inputs = [jnp.pad(x, ((0, 0), (0, self.dp_in - d)))]
        if self.stoch:
            if key is None:
                raise ValueError("stoch=True forward needs a PRNG key for the conditional noise")
            eps = jax.random.normal(key, (batch, self.noise_dim), dtype=jnp.float32)
            inputs.append(jnp.pad(eps, ((0, 0), (0, self.dp_noise - self.noise_dim))))
        inputs += self._noise_params
        inputs += self._out_params

        tb = self._pick_batch_tile(batch)
        grid = (pl.cdiv(batch, tb),)

        def tiled_spec(cols):
            return pl.BlockSpec((tb, cols), lambda i: (i, 0))

        def whole_spec(arr):
            nd = arr.ndim
            return pl.BlockSpec(arr.shape, lambda i, _nd=nd: (0,) * _nd)

        in_specs = [tiled_spec(self.dp_in)]
        if self.stoch:
            in_specs.append(tiled_spec(self.dp_noise))
        for p in self._noise_params + self._out_params:
            in_specs.append(whole_spec(p))

        cost = pl.CostEstimate(
            flops=int(self._flops_per_row) * int(batch),
            transcendentals=(int(batch) * self.dp_noise) if self.stoch else 0,
            bytes_accessed=int(self._param_bytes)
            + 4 * int(batch) * (self.dp_in + (self.dp_noise if self.stoch else 0) + self.dp_out),
        )

        out_pad = pl.pallas_call(
            self._kernel,
            out_shape=jax.ShapeDtypeStruct((batch, self.dp_out), jnp.float32),
            grid=grid,
            in_specs=in_specs,
            out_specs=tiled_spec(self.dp_out),
            compiler_params=pltpu.CompilerParams(
                dimension_semantics=("parallel",),
                vmem_limit_bytes=64 * 1024 * 1024,
            ),
            cost_estimate=cost,
        )(*inputs)

        # TODO(synk): inv_masses branch (E^2 = p^2 + m^2 reconstruction) would go here.
        return out_pad[:, : self.output_dim]


# ---------------------------------------------------------------------- reference
def reference_forward(model, x, key=None):
    """Pure-JAX (un-padded, un-folded) reference mirroring CondNoiseMLP.forward."""
    x = jnp.asarray(x, jnp.float32)
    if model.input_stats is not None:
        x = (x - model.input_stats[0]) / model.input_stats[1]
    if model.stoch:
        h = x
        n = len(model._raw_noise)
        for i, (w, b) in enumerate(model._raw_noise):
            h = h @ w + b
            if i < n - 1:
                h = jnp.maximum(h, 0.0)
        mean, logsig = h[:, :model.noise_dim], h[:, model.noise_dim:]
        sigma = jnp.exp(logsig) if model.sigma_fun == 'exp' else _softplus(logsig)
        eps = jax.random.normal(key, (x.shape[0], model.noise_dim), dtype=jnp.float32)
        x = jnp.concatenate([x, mean + eps * sigma], axis=-1)
    a = x
    n = len(model._raw_out)
    for i, (w, b) in enumerate(model._raw_out):
        a = a @ w + b
        if i < n - 1:
            a = jnp.maximum(a, 0.0)
    if model.output_raw and model.output_stats is not None:
        a = a * model.output_stats[1] + model.output_stats[0]
    return a


if __name__ == "__main__":
    root = jax.random.PRNGKey(0)
    k_p1, k_p2, k_p3, k_x, k_e1, k_e3 = jax.random.split(root, 6)

    B, IN_DIM, OUT_DIM = 64, 6, 4
    HIDDEN = [32, 32]
    x = jax.random.normal(k_x, (B, IN_DIM), dtype=jnp.float32) * 2.0 + 0.5

    in_stats = jnp.stack([jnp.full((IN_DIM,), 0.5, jnp.float32),
                          jnp.full((IN_DIM,), 2.0, jnp.float32)])
    out_stats = jnp.stack([jnp.linspace(-1.0, 1.0, OUT_DIM, dtype=jnp.float32),
                           jnp.linspace(0.5, 2.0, OUT_DIM, dtype=jnp.float32)])

    # 1) stochastic conditional-noise model, f32 matmuls, raw input standardized via input_stats
    m1 = CondNoiseMLPPallas(IN_DIM, OUT_DIM, HIDDEN, stoch=True, key=k_p1,
                            input_stats=in_stats, sigma_fun='exp')
    y1 = m1(x, key=k_e1)
    jax.block_until_ready(y1)
    r1 = reference_forward(m1, x, key=k_e1)
    assert y1.shape == (B, OUT_DIM)
    assert jnp.allclose(y1, r1, atol=5e-4, rtol=5e-4)

    # 2) deterministic model, raw output (un-standardized by output_stats)
    m2 = CondNoiseMLPPallas(IN_DIM, OUT_DIM, HIDDEN, stoch=False, key=k_p2,
                            output_stats=out_stats, output_raw=True)
    y2 = m2(x)
    jax.block_until_ready(y2)
    r2 = reference_forward(m2, x)
    assert y2.shape == (B, OUT_DIM)
    assert jnp.allclose(y2, r2, atol=5e-4, rtol=5e-4)

    # 3) stochastic model with bf16 matmul inputs (v6e/v7x MXU fast path), softplus sigma
    m3 = CondNoiseMLPPallas(IN_DIM, OUT_DIM, HIDDEN, stoch=True, key=k_p3,
                            sigma_fun='softplus', matmul_dtype=jnp.bfloat16)
    y3 = m3(x, key=k_e3)
    jax.block_until_ready(y3)
    r3 = reference_forward(m3, x, key=k_e3)
    assert y3.shape == (B, OUT_DIM)
    assert jnp.allclose(y3, r3, atol=1e-1, rtol=1e-1)

    print("KERNEL_OK")
</pallas_src>

<mosaic_0001>
module attributes {stable_mosaic.version = 11 : i64} {
  func.func @kernel(%arg0: i32, %arg1: memref<32x128xf32, #tpu.memory_space<vmem>>, %arg2: memref<32x128xf32, #tpu.memory_space<vmem>>, %arg3: memref<128x128xf32, #tpu.memory_space<vmem>>, %arg4: memref<1x128xf32, #tpu.memory_space<vmem>>, %arg5: memref<128x128xf32, #tpu.memory_space<vmem>>, %arg6: memref<1x128xf32, #tpu.memory_space<vmem>>, %arg7: memref<128x128xf32, #tpu.memory_space<vmem>>, %arg8: memref<1x128xf32, #tpu.memory_space<vmem>>, %arg9: memref<128x128xf32, #tpu.memory_space<vmem>>, %arg10: memref<1x128xf32, #tpu.memory_space<vmem>>, %arg11: memref<128x128xf32, #tpu.memory_space<vmem>>, %arg12: memref<128x128xf32, #tpu.memory_space<vmem>>, %arg13: memref<1x128xf32, #tpu.memory_space<vmem>>, %arg14: memref<128x128xf32, #tpu.memory_space<vmem>>, %arg15: memref<1x128xf32, #tpu.memory_space<vmem>>, %arg16: memref<128x128xf32, #tpu.memory_space<vmem>>, %arg17: memref<1x128xf32, #tpu.memory_space<vmem>>, %arg18: memref<32x128xf32, #tpu.memory_space<vmem>>) attributes {dimension_semantics = [#tpu.dimension_semantics<parallel>], iteration_bounds = array<i64: 2>, scalar_prefetch = 0 : i64, scratch_operands = 0 : i64, tpu.core_type = #tpu.core_type<tc>, window_params = [{transform_indices = @transform_0, window_bounds = array<i64: 32, 128>}, {transform_indices = @transform_1, window_bounds = array<i64: 32, 128>}, {pipeline_mode = #tpu.pipeline_mode<synchronous>, transform_indices = @transform_2, window_bounds = array<i64: 128, 128>}, {pipeline_mode = #tpu.pipeline_mode<synchronous>, transform_indices = @transform_3, window_bounds = array<i64: 1, 128>}, {pipeline_mode = #tpu.pipeline_mode<synchronous>, transform_indices = @transform_4, window_bounds = array<i64: 128, 128>}, {pipeline_mode = #tpu.pipeline_mode<synchronous>, transform_indices = @transform_5, window_bounds = array<i64: 1, 128>}, {pipeline_mode = #tpu.pipeline_mode<synchronous>, transform_indices = @transform_6, window_bounds = array<i64: 128, 128>}, {pipeline_mode = #tpu.pipeline_mode<synchronous>, transform_indices = @transform_7, window_bounds = array<i64: 1, 128>}, {pipeline_mode = #tpu.pipeline_mode<synchronous>, transform_indices = @transform_8, window_bounds = array<i64: 128, 128>}, {pipeline_mode = #tpu.pipeline_mode<synchronous>, transform_indices = @transform_9, window_bounds = array<i64: 1, 128>}, {pipeline_mode = #tpu.pipeline_mode<synchronous>, transform_indices = @transform_10, window_bounds = array<i64: 128, 128>}, {pipeline_mode = #tpu.pipeline_mode<synchronous>, transform_indices = @transform_11, window_bounds = array<i64: 128, 128>}, {pipeline_mode = #tpu.pipeline_mode<synchronous>, transform_indices = @transform_12, window_bounds = array<i64: 1, 128>}, {pipeline_mode = #tpu.pipeline_mode<synchronous>, transform_indices = @transform_13, window_bounds = array<i64: 128, 128>}, {pipeline_mode = #tpu.pipeline_mode<synchronous>, transform_indices = @transform_14, window_bounds = array<i64: 1, 128>}, {pipeline_mode = #tpu.pipeline_mode<synchronous>, transform_indices = @transform_15, window_bounds = array<i64: 128, 128>}, {pipeline_mode = #tpu.pipeline_mode<synchronous>, transform_indices = @transform_16, window_bounds = array<i64: 1, 128>}, {transform_indices = @transform_17, window_bounds = array<i64: 32, 128>}]} {
    %c0 = arith.constant 0 : index
    %c0_0 = arith.constant 0 : index
    %0 = vector.load %arg1[%c0, %c0_0] : memref<32x128xf32, #tpu.memory_space<vmem>>, vector<32x128xf32>
    %c0_1 = arith.constant 0 : index
    %c0_2 = arith.constant 0 : index
    %1 = vector.load %arg2[%c0_1, %c0_2] : memref<32x128xf32, #tpu.memory_space<vmem>>, vector<32x128xf32>
    %c0_3 = arith.constant 0 : index
    %c0_4 = arith.constant 0 : index
    %2 = vector.load %arg3[%c0_3, %c0_4] : memref<128x128xf32, #tpu.memory_space<vmem>>, vector<128x128xf32>
    %cst = arith.constant dense<0.000000e+00> : vector<32x128xf32>
    %3 = tpu.matmul %0, %2, %cst {dimension_numbers = #tpu.dot_dimension_numbers<[1], [0], [0], [1], [0, 0, 1, 1], [], []>} : vector<32x128xf32>, vector<128x128xf32>, vector<32x128xf32> -> vector<32x128xf32>
    %c0_5 = arith.constant 0 : index
    %c0_6 = arith.constant 0 : index
    %4 = vector.load %arg4[%c0_5, %c0_6] : memref<1x128xf32, #tpu.memory_space<vmem>>, vector<1x128xf32>
    %5 = vector.broadcast %4 : vector<1x128xf32> to vector<32x128xf32>
    %6 = arith.addf %3, %5 : vector<32x128xf32>
    %cst_7 = arith.constant 0.000000e+00 : f32
    %7 = vector.broadcast %cst_7 : f32 to vector<32x128xf32>
    %8 = arith.maximumf %6, %7 : vector<32x128xf32>
    %c0_8 = arith.constant 0 : index
    %c0_9 = arith.constant 0 : index
    %9 = vector.load %arg5[%c0_8, %c0_9] : memref<128x128xf32, #tpu.memory_space<vmem>>, vector<128x128xf32>
    %cst_10 = arith.constant dense<0.000000e+00> : vector<32x128xf32>
    %10 = tpu.matmul %8, %9, %cst_10 {dimension_numbers = #tpu.dot_dimension_numbers<[1], [0], [0], [1], [0, 0, 1, 1], [], []>} : vector<32x128xf32>, vector<128x128xf32>, vector<32x128xf32> -> vector<32x128xf32>
    %c0_11 = arith.constant 0 : index
    %c0_12 = arith.constant 0 : index
    %11 = vector.load %arg6[%c0_11, %c0_12] : memref<1x128xf32, #tpu.memory_space<vmem>>, vector<1x128xf32>
    %12 = vector.broadcast %11 : vector<1x128xf32> to vector<32x128xf32>
    %13 = arith.addf %10, %12 : vector<32x128xf32>
    %cst_13 = arith.constant 0.000000e+00 : f32
    %14 = vector.broadcast %cst_13 : f32 to vector<32x128xf32>
    %15 = arith.maximumf %13, %14 : vector<32x128xf32>
    %c0_14 = arith.constant 0 : index
    %c0_15 = arith.constant 0 : index
    %16 = vector.load %arg7[%c0_14, %c0_15] : memref<128x128xf32, #tpu.memory_space<vmem>>, vector<128x128xf32>
    %cst_16 = arith.constant dense<0.000000e+00> : vector<32x128xf32>
    %17 = tpu.matmul %15, %16, %cst_16 {dimension_numbers = #tpu.dot_dimension_numbers<[1], [0], [0], [1], [0, 0, 1, 1], [], []>} : vector<32x128xf32>, vector<128x128xf32>, vector<32x128xf32> -> vector<32x128xf32>
    %c0_17 = arith.constant 0 : index
    %c0_18 = arith.constant 0 : index
    %18 = vector.load %arg8[%c0_17, %c0_18] : memref<1x128xf32, #tpu.memory_space<vmem>>, vector<1x128xf32>
    %19 = vector.broadcast %18 : vector<1x128xf32> to vector<32x128xf32>
    %20 = arith.addf %17, %19 : vector<32x128xf32>
    %c0_19 = arith.constant 0 : index
    %c0_20 = arith.constant 0 : index
    %21 = vector.load %arg9[%c0_19, %c0_20] : memref<128x128xf32, #tpu.memory_space<vmem>>, vector<128x128xf32>
    %cst_21 = arith.constant dense<0.000000e+00> : vector<32x128xf32>
    %22 = tpu.matmul %15, %21, %cst_21 {dimension_numbers = #tpu.dot_dimension_numbers<[1], [0], [0], [1], [0, 0, 1, 1], [], []>} : vector<32x128xf32>, vector<128x128xf32>, vector<32x128xf32> -> vector<32x128xf32>
    %c0_22 = arith.constant 0 : index
    %c0_23 = arith.constant 0 : index
    %23 = vector.load %arg10[%c0_22, %c0_23] : memref<1x128xf32, #tpu.memory_space<vmem>>, vector<1x128xf32>
    %24 = vector.broadcast %23 : vector<1x128xf32> to vector<32x128xf32>
    %25 = arith.addf %22, %24 : vector<32x128xf32>
    %26 = math.exp %25 : vector<32x128xf32>
    %27 = arith.mulf %1, %26 : vector<32x128xf32>
    %28 = arith.addf %20, %27 : vector<32x128xf32>
    %c0_24 = arith.constant 0 : index
    %c0_25 = arith.constant 0 : index
    %29 = vector.load %arg11[%c0_24, %c0_25] : memref<128x128xf32, #tpu.memory_space<vmem>>, vector<128x128xf32>
    %cst_26 = arith.constant dense<0.000000e+00> : vector<32x128xf32>
    %30 = tpu.matmul %0, %29, %cst_26 {dimension_numbers = #tpu.dot_dimension_numbers<[1], [0], [0], [1], [0, 0, 1, 1], [], []>} : vector<32x128xf32>, vector<128x128xf32>, vector<32x128xf32> -> vector<32x128xf32>
    %c0_27 = arith.constant 0 : index
    %c0_28 = arith.constant 0 : index
    %31 = vector.load %arg12[%c0_27, %c0_28] : memref<128x128xf32, #tpu.memory_space<vmem>>, vector<128x128xf32>
    %cst_29 = arith.constant dense<0.000000e+00> : vector<32x128xf32>
    %32 = tpu.matmul %28, %31, %cst_29 {dimension_numbers = #tpu.dot_dimension_numbers<[1], [0], [0], [1], [0, 0, 1, 1], [], []>} : vector<32x128xf32>, vector<128x128xf32>, vector<32x128xf32> -> vector<32x128xf32>
    %33 = arith.addf %30, %32 : vector<32x128xf32>
    %c0_30 = arith.constant 0 : index
    %c0_31 = arith.constant 0 : index
    %34 = vector.load %arg13[%c0_30, %c0_31] : memref<1x128xf32, #tpu.memory_space<vmem>>, vector<1x128xf32>
    %35 = vector.broadcast %34 : vector<1x128xf32> to vector<32x128xf32>
    %36 = arith.addf %33, %35 : vector<32x128xf32>
    %cst_32 = arith.constant 0.000000e+00 : f32
    %37 = vector.broadcast %cst_32 : f32 to vector<32x128xf32>
    %38 = arith.maximumf %36, %37 : vector<32x128xf32>
    %c0_33 = arith.constant 0 : index
    %c0_34 = arith.constant 0 : index
    %39 = vector.load %arg14[%c0_33, %c0_34] : memref<128x128xf32, #tpu.memory_space<vmem>>, vector<128x128xf32>
    %cst_35 = arith.constant dense<0.000000e+00> : vector<32x128xf32>
    %40 = tpu.matmul %38, %39, %cst_35 {dimension_numbers = #tpu.dot_dimension_numbers<[1], [0], [0], [1], [0, 0, 1, 1], [], []>} : vector<32x128xf32>, vector<128x128xf32>, vector<32x128xf32> -> vector<32x128xf32>
    %c0_36 = arith.constant 0 : index
    %c0_37 = arith.constant 0 : index
    %41 = vector.load %arg15[%c0_36, %c0_37] : memref<1x128xf32, #tpu.memory_space<vmem>>, vector<1x128xf32>
    %42 = vector.broadcast %41 : vector<1x128xf32> to vector<32x128xf32>
    %43 = arith.addf %40, %42 : vector<32x128xf32>
    %cst_38 = arith.constant 0.000000e+00 : f32
    %44 = vector.broadcast %cst_38 : f32 to vector<32x128xf32>
    %45 = arith.maximumf %43, %44 : vector<32x128xf32>
    %c0_39 = arith.constant 0 : index
    %c0_40 = arith.constant 0 : index
    %46 = vector.load %arg16[%c0_39, %c0_40] : memref<128x128xf32, #tpu.memory_space<vmem>>, vector<128x128xf32>
    %cst_41 = arith.constant dense<0.000000e+00> : vector<32x128xf32>
    %47 = tpu.matmul %45, %46, %cst_41 {dimension_numbers = #tpu.dot_dimension_numbers<[1], [0], [0], [1], [0, 0, 1, 1], [], []>} : vector<32x128xf32>, vector<128x128xf32>, vector<32x128xf32> -> vector<32x128xf32>
    %c0_42 = arith.constant 0 : index
    %c0_43 = arith.constant 0 : index
    %48 = vector.load %arg17[%c0_42, %c0_43] : memref<1x128xf32, #tpu.memory_space<vmem>>, vector<1x128xf32>
    %49 = vector.broadcast %48 : vector<1x128xf32> to vector<32x128xf32>
    %50 = arith.addf %47, %49 : vector<32x128xf32>
    %c0_44 = arith.constant 0 : index
    %c0_45 = arith.constant 0 : index
    %51 = vector.load %arg18[%c0_44, %c0_45] : memref<32x128xf32, #tpu.memory_space<vmem>>, vector<32x128xf32>
    tpu.vector_store %arg18[%c0_44, %c0_45], %50 {strides = array<i32>} : memref<32x128xf32, #tpu.memory_space<vmem>>, vector<32x128xf32>,
    return
  }
  func.func @transform_0(%arg0: i32) -> (i32, i32) {
    %c0_i32 = arith.constant 0 : i32
    %c0_i32_0 = arith.constant 0 : i32
    return %arg0, %c0_i32 : i32, i32
  }
  func.func @transform_1(%arg0: i32) -> (i32, i32) {
    %c0_i32 = arith.constant 0 : i32
    %c0_i32_0 = arith.constant 0 : i32
    return %arg0, %c0_i32 : i32, i32
  }
  func.func @transform_2(%arg0: i32) -> (i32, i32) {
    %c0_i32 = arith.constant 0 : i32
    %c0_i32_0 = arith.constant 0 : i32
    %c0_i32_1 = arith.constant 0 : i32
    return %c0_i32, %c0_i32_0 : i32, i32
  }
  func.func @transform_3(%arg0: i32) -> (i32, i32) {
    %c0_i32 = arith.constant 0 : i32
    %c0_i32_0 = arith.constant 0 : i32
    %c0_i32_1 = arith.constant 0 : i32
    return %c0_i32, %c0_i32_0 : i32, i32
  }
  func.func @transform_4(%arg0: i32) -> (i32, i32) {
    %c0_i32 = arith.constant 0 : i32
    %c0_i32_0 = arith.constant 0 : i32
    %c0_i32_1 = arith.constant 0 : i32
    return %c0_i32, %c0_i32_0 : i32, i32
  }
  func.func @transform_5(%arg0: i32) -> (i32, i32) {
    %c0_i32 = arith.constant 0 : i32
    %c0_i32_0 = arith.constant 0 : i32
    %c0_i32_1 = arith.constant 0 : i32
    return %c0_i32, %c0_i32_0 : i32, i32
  }
  func.func @transform_6(%arg0: i32) -> (i32, i32) {
    %c0_i32 = arith.constant 0 : i32
    %c0_i32_0 = arith.constant 0 : i32
    %c0_i32_1 = arith.constant 0 : i32
    return %c0_i32, %c0_i32_0 : i32, i32
  }
  func.func @transform_7(%arg0: i32) -> (i32, i32) {
    %c0_i32 = arith.constant 0 : i32
    %c0_i32_0 = arith.constant 0 : i32
    %c0_i32_1 = arith.constant 0 : i32
    return %c0_i32, %c0_i32_0 : i32, i32
  }
  func.func @transform_8(%arg0: i32) -> (i32, i32) {
    %c0_i32 = arith.constant 0 : i32
    %c0_i32_0 = arith.constant 0 : i32
    %c0_i32_1 = arith.constant 0 : i32
    return %c0_i32, %c0_i32_0 : i32, i32
  }
  func.func @transform_9(%arg0: i32) -> (i32, i32) {
    %c0_i32 = arith.constant 0 : i32
    %c0_i32_0 = arith.constant 0 : i32
    %c0_i32_1 = arith.constant 0 : i32
    return %c0_i32, %c0_i32_0 : i32, i32
  }
  func.func @transform_10(%arg0: i32) -> (i32, i32) {
    %c0_i32 = arith.constant 0 : i32
    %c0_i32_0 = arith.constant 0 : i32
    %c0_i32_1 = arith.constant 0 : i32
    return %c0_i32, %c0_i32_0 : i32, i32
  }
  func.func @transform_11(%arg0: i32) -> (i32, i32) {
    %c0_i32 = arith.constant 0 : i32
    %c0_i32_0 = arith.constant 0 : i32
    %c0_i32_1 = arith.constant 0 : i32
    return %c0_i32, %c0_i32_0 : i32, i32
  }
  func.func @transform_12(%arg0: i32) -> (i32, i32) {
    %c0_i32 = arith.constant 0 : i32
    %c0_i32_0 = arith.constant 0 : i32
    %c0_i32_1 = arith.constant 0 : i32
    return %c0_i32, %c0_i32_0 : i32, i32
  }
  func.func @transform_13(%arg0: i32) -> (i32, i32) {
    %c0_i32 = arith.constant 0 : i32
    %c0_i32_0 = arith.constant 0 : i32
    %c0_i32_1 = arith.constant 0 : i32
    return %c0_i32, %c0_i32_0 : i32, i32
  }
  func.func @transform_14(%arg0: i32) -> (i32, i32) {
    %c0_i32 = arith.constant 0 : i32
    %c0_i32_0 = arith.constant 0 : i32
    %c0_i32_1 = arith.constant 0 : i32
    return %c0_i32, %c0_i32_0 : i32, i32
  }
  func.func @transform_15(%arg0: i32) -> (i32, i32) {
    %c0_i32 = arith.constant 0 : i32
    %c0_i32_0 = arith.constant 0 : i32
    %c0_i32_1 = arith.constant 0 : i32
    return %c0_i32, %c0_i32_0 : i32, i32
  }
  func.func @transform_16(%arg0: i32) -> (i32, i32) {
    %c0_i32 = arith.constant 0 : i32
    %c0_i32_0 = arith.constant 0 : i32
    %c0_i32_1 = arith.constant 0 : i32
    return %c0_i32, %c0_i32_0 : i32, i32
  }
  func.func @transform_17(%arg0: i32) -> (i32, i32) {
    %c0_i32 = arith.constant 0 : i32
    %c0_i32_0 = arith.constant 0 : i32
    return %arg0, %c0_i32 : i32, i32
  }
}

</mosaic_0001>

<bundles_post_ra>
// kernel: tpu_custom_call.1
= control target key start
LH: loop header
LB: loop body
LE: loop exit
PB: predicated region body
PF: predicated region fallthrough
CT: control target
= control target key end

     0   :  { %s3322_s0 = inlined_call_operand.hbm [shape: f32[64,128], index: 0, kind: input, shape index: {}]   ;;  %s3323_s1 = inlined_call_operand.hbm [shape: f32[64,128], index: 1, kind: input, shape index: {}]   ;;  %s3324_s2 = inlined_call_operand.hbm [shape: f32[128,128], index: 2, kind: input, shape index: {}]   ;;  %s3325_s3 = inlined_call_operand.vmem [shape: f32[1,128], index: 3, kind: input, shape index: {}]   ;;  %s3326_s4 = inlined_call_operand.hbm [shape: f32[128,128], index: 4, kind: input, shape index: {}]   ;;  %s3327_s5 = inlined_call_operand.vmem [shape: f32[1,128], index: 5, kind: input, shape index: {}]   ;;  %s3328_s6 = inlined_call_operand.hbm [shape: f32[128,128], index: 6, kind: input, shape index: {}]   ;;  %s3329_s7 = inlined_call_operand.vmem [shape: f32[1,128], index: 7, kind: input, shape index: {}]   ;;  %s3330_s8 = inlined_call_operand.hbm [shape: f32[128,128], index: 8, kind: input, shape index: {}]   ;;  %s3331_s9 = inlined_call_operand.vmem [shape: f32[1,128], index: 9, kind: input, shape index: {}]   ;;  %s3332_s10 = inlined_call_operand.hbm [shape: f32[128,128], index: 10, kind: input, shape index: {}]   ;;  %s3333_s11 = inlined_call_operand.hbm [shape: f32[128,128], index: 11, kind: input, shape index: {}]   ;;  %s3334_s12 = inlined_call_operand.vmem [shape: f32[1,128], index: 12, kind: input, shape index: {}]   ;;  %s3335_s13 = inlined_call_operand.hbm [shape: f32[128,128], index: 13, kind: input, shape index: {}]   ;;  %s3336_s14 = inlined_call_operand.vmem [shape: f32[1,128], index: 14, kind: input, shape index: {}]   ;;  %s3337_s15 = inlined_call_operand.hbm [shape: f32[128,128], index: 15, kind: input, shape index: {}]   ;;  %s3338_s16 = inlined_call_operand.vmem [shape: f32[1,128], index: 16, kind: input, shape index: {}]   ;;  %s3339_s17 = inlined_call_operand.hbm [shape: f32[64,128], index: 17, kind: output, shape index: {}]  }
   0x1   :  { %3354 = sst [smem:[#allocation31_spill]] %s3322_s0 }
   0x2   :  { %3355 = sst [smem:[#allocation32_spill]] %s3323_s1 }
   0x3   :  { %3356 = sst [smem:[#allocation33_spill]] %s3324_s2 }
   0x4   :  { %3357 = sst [smem:[#allocation34_spill]] %s3326_s4 }
   0x5   :  { %3358 = sst [smem:[#allocation35_spill]] %s3328_s6 }
   0x6   :  { %3359 = sst [smem:[#allocation36_spill]] %s3330_s8 }
   0x7   :  { %3360 = sst [smem:[#allocation37_spill]] %s3332_s10 }
   0x8   :  { %3361 = sst [smem:[#allocation38_spill]] %s3333_s11 }
   0x9   :  { %3362 = sst [smem:[#allocation39_spill]] %s3335_s13 }
   0xa   :  { %3363 = sst [smem:[#allocation40_spill]] %s3337_s15 }
   0xb   :  { %3364 = sst [smem:[#allocation41_spill]] %s3338_s16 }
   0xc   :  { %3365 = sst [smem:[#allocation42_spill]] %s3339_s17 }
   0xd   :  { %22 = vsyncpa [#allocation3], 0 }
   0xe   :  { %24 = vsyncpa [#allocation3 + $0x1], 0 }
   0xf   :  { %25 = vsyncpa [#allocation6], 0 }
  0x10   :  { %27 = vsyncpa [#allocation6 + $0x1], 0 }
  0x11   :  { %28 = vsyncpa [#allocation9], 0 }
  0x12   :  { %29 = vsyncpa [#allocation12], 0 }
  0x13   :  { %30 = vsyncpa [#allocation15], 0 }
  0x14   :  { %31 = vsyncpa [#allocation18], 0 }
  0x15   :  { %32 = vsyncpa [#allocation4], 0 }
  0x16   :  { %34 = vsyncpa [#allocation4 + $0x1], 0  ;;  %s2928_s24 = smov 0   ;;  %s2930_s25 = smov 0  }
  0x17   :  { %s2932_s26 = smov 0   ;;  %s2934_s27 = smov 0  }
  0x18 LB: > { %3366 = sst [smem:[#allocation28_spill]] %s2817_s26  ;;  %s2823_s28 = smov [#allocation7]   ;;  %s2821_s27 = sphi %s2934_s27, %s3405_s27   ;;  %s2817_s26 = sphi %s2932_s26, %s3407_s26   ;;  %s2813_s25 = sphi %s2930_s25, %s3409_s25   ;;  %s2809_s24 = sphi %s2928_s24, %s3408_s24  }
  0x19   : > { %s450_s29 = sshll.u32 %s2823_s28, 4  ;;  %s2949_s0 = sadd.s32 4294967295, %s2821_s27   ;;  %s451_s29 = int_to_ptr.vmem [resolvable:$true] %s450_s29 }
  0x1a   : > { %p1818_p0 = scmp.ge.s32.totalorder %s2821_s27, 1  ;;  %p3350_p1 = scmp.eq.s32.totalorder %s2949_s0, 0 }
  0x1b   : > { %p438_p2 = scmp.lt.s32.totalorder %s2821_s27, 3  ;;  %s2824_s18 = smov [#allocation8]  }
  0x1c   : > { %s466_s19 = sshll.u32 %s2824_s18, 4  ;;  %s2825_s20 = smov [#allocation11]   ;;  %s2967_s19 = int_to_ptr.vmem [resolvable:$true] %s466_s19 }
  0x1d   : > { %p2954_p3 = pnand %p1818_p0, %p438_p2  ;;  %s498_s21 = sshll.u32 %s2825_s20, 4  ;;  %s2969_s21 = int_to_ptr.vmem [resolvable:$true] %s498_s21 }
  0x1e   : > { %s2480_s23 = scalar_lea.vmem %s451_s29, 2048  ;;  %p2488_p11 = scmp.lt.s32.totalorder %s451_s29, %s451_s29 }
  0x1f   : > { %p2363_p5 = pneg %p2954_p3  ;;  %p2481_p8 = scmp.ne.s32.totalorder %s451_s29, %s2480_s23 }
  0x20   : > { %p2489_p12 = scmp.lt.s32.totalorder %s2480_s23, %s2480_s23 }
  0x21   : > { %p2963_p6 = pnand %p2363_p5, %p3350_p1 }
  0x22   : > { %p2490_p13 = por %p2489_p12, %p2488_p11 }
  0x23   : > { %p2973_p7 = pneg %p2963_p6 }
  0x25   : > { %p2483_p9 = pnand %p2481_p8, %p2973_p7 }
  0x27   : > { %p2484_p10 = pneg %p2483_p9 }
  0x29   : > { %p2491_p0 = pnand %p2490_p13, %p2484_p10 }
  0x2b   : > { %2494 = shalt.err (!%p2491_p0)
}
  0x2c   : > { %s3343_s28 = smov 128   ;;  %s3345_s18 = smov 8  }
  0x2d   : > { %s3370_s2 = sld [smem:[#allocation33_spill]]  ;;  %s2506_s16 = scalar_lea.vmem %s2967_s19, 2048 }
  0x2e   : > { %p2507_p2 = scmp.ne.s32.totalorder %s2967_s19, %s2506_s16  ;;  %p2514_p9 = scmp.lt.s32.totalorder %s2967_s19, %s2967_s19 }
  0x2f   : > { %p2515_p10 = scmp.lt.s32.totalorder %s2506_s16, %s2506_s16 }
  0x30   : > { %p2509_p5 = pnand %p2507_p2, %p2973_p7 }
  0x31   : > { %p2516_p11 = por %p2515_p10, %p2514_p9 }
  0x32   : > { %p2510_p8 = pneg %p2509_p5 }
  0x33   : > { %2366 = dma.hbm_to_vmem [thread:$0]  (!%p2963_p6), %s3370_s2, 2048, %s451_s29, [#allocation6], %s3343_s28, %s3343_s28, %s3345_s18  }
  0x34   : > { %p2517_p12 = pnand %p2516_p11, %p2510_p8 }
  0x36   : > { %2520 = shalt.err (!%p2517_p12)
}
  0x37   : > { %s3371_s4 = sld [smem:[#allocation34_spill]]  ;;  %s2532_s29 = scalar_lea.vmem %s2969_s21, 2048 }
  0x38   : > { %p2533_p13 = scmp.ne.s32.totalorder %s2969_s21, %s2532_s29  ;;  %p2540_p5 = scmp.lt.s32.totalorder %s2969_s21, %s2969_s21 }
  0x39   : > { %p2541_p8 = scmp.lt.s32.totalorder %s2532_s29, %s2532_s29 }
  0x3a   : > { %p2535_p0 = pnand %p2533_p13, %p2973_p7 }
  0x3b   : > { %p2542_p9 = por %p2541_p8, %p2540_p5 }
  0x3c   : > { %p2536_p2 = pneg %p2535_p0 }
  0x3d   : > { %2369 = dma.hbm_to_vmem [thread:$0]  (!%p2963_p6), %s3371_s4, 2048, %s2967_s19, [#allocation9], %s3343_s28, %s3343_s28, %s3345_s18  }
  0x3e   : > { %p2543_p10 = pnand %p2542_p9, %p2536_p2 }
  0x40   : > { %2546 = shalt.err (!%p2543_p10)
}
  0x41   : > { %s3372_s8 = sld [smem:[#allocation36_spill]]  ;;  %s2828_s19 = smov [#allocation14]  }
  0x42   : > { %s527_s23 = sshll.u32 %s2828_s19, 4  ;;  %s2829_s17 = smov [#allocation10]   ;;  %s528_s23 = int_to_ptr.vmem [resolvable:$true] %s527_s23 }
  0x43   : > { %s482_s2 = sshll.u32 %s2829_s17, 4  ;;  %s2558_s29 = scalar_lea.vmem %s528_s23, 2048  ;;  %s483_s2 = int_to_ptr.vmem [resolvable:$true] %s482_s2 }
  0x44   : > { %p2559_p11 = scmp.ne.s32.totalorder %s528_s23, %s2558_s29  ;;  %p2566_p0 = scmp.lt.s32.totalorder %s528_s23, %s528_s23 }
  0x45   : > { %p2567_p2 = scmp.lt.s32.totalorder %s2558_s29, %s2558_s29 }
  0x46   : > { %p2561_p12 = pnand %p2559_p11, %p2973_p7 }
  0x47   : > { %2375 = dma.hbm_to_vmem [thread:$0]  (!%p2963_p6), %s3372_s8, 2048, %s2969_s21, [#allocation12], %s3343_s28, %s3343_s28, %s3345_s18  }
  0x48   : > { %p2562_p13 = pneg %p2561_p12  ;;  %p2568_p5 = por %p2567_p2, %p2566_p0 }
  0x4a   : > { %p2569_p8 = pnand %p2568_p5, %p2562_p13 }
  0x4c   : > { %2572 = shalt.err (!%p2569_p8)
}
  0x4d   : > { %s3373_s11 = sld [smem:[#allocation38_spill]]  ;;  %s2584_s20 = scalar_lea.vmem %s483_s2, 2048 }
  0x4e   : > { %p2585_p9 = scmp.ne.s32.totalorder %s483_s2, %s2584_s20  ;;  %p2592_p12 = scmp.lt.s32.totalorder %s483_s2, %s483_s2 }
  0x4f   : > { %p2593_p0 = scmp.lt.s32.totalorder %s2584_s20, %s2584_s20 }
  0x50   : > { %p2587_p10 = pnand %p2585_p9, %p2973_p7 }
  0x51   : > { %p2594_p13 = por %p2593_p0, %p2592_p12 }
  0x52   : > { %p2588_p11 = pneg %p2587_p10 }
  0x53   : > { %2381 = dma.hbm_to_vmem [thread:$0]  (!%p2963_p6), %s3373_s11, 2048, %s528_s23, [#allocation15], %s3343_s28, %s3343_s28, %s3345_s18  }
  0x54   : > { %p2595_p2 = pnand %p2594_p13, %p2588_p11 }
  0x56   : > { %2598 = shalt.err (!%p2595_p2)
}
  0x57   : > { %s3374_s6 = sld [smem:[#allocation35_spill]]  ;;  %s2830_s23 = smov [#allocation13]  }
  0x58   : > { %s514_s29 = sshll.u32 %s2830_s23, 4  ;;  %s2831_s21 = smov [#allocation16]   ;;  %s515_s29 = int_to_ptr.vmem [resolvable:$true] %s514_s29 }
  0x59   : > { %s543_s16 = sshll.u32 %s2831_s21, 4  ;;  %s2610_s4 = scalar_lea.vmem %s515_s29, 2048  ;;  %s544_s16 = int_to_ptr.vmem [resolvable:$true] %s543_s16 }
  0x5a   : > { %p2611_p5 = scmp.ne.s32.totalorder %s515_s29, %s2610_s4  ;;  %p2618_p10 = scmp.lt.s32.totalorder %s515_s29, %s515_s29 }
  0x5b   : > { %p2619_p11 = scmp.lt.s32.totalorder %s2610_s4, %s2610_s4 }
  0x5c   : > { %p2613_p8 = pnand %p2611_p5, %p2973_p7 }
  0x5d   : > { %2372 = dma.hbm_to_vmem [thread:$0]  (!%p2963_p6), %s3374_s6, 2048, %s483_s2, [#allocation9], %s3343_s28, %s3343_s28, %s3345_s18  }
  0x5e   : > { %p2614_p9 = pneg %p2613_p8  ;;  %p2620_p12 = por %p2619_p11, %p2618_p10 }
  0x60   : > { %p2621_p0 = pnand %p2620_p12, %p2614_p9 }
  0x62   : > { %2624 = shalt.err (!%p2621_p0)
}
  0x63   : > { %s3375_s10 = sld [smem:[#allocation37_spill]]  ;;  %s2636_s19 = scalar_lea.vmem %s544_s16, 2048 }
  0x64   : > { %p2637_p13 = scmp.ne.s32.totalorder %s544_s16, %s2636_s19  ;;  %p2644_p8 = scmp.lt.s32.totalorder %s544_s16, %s544_s16 }
  0x65   : > { %p2645_p10 = scmp.lt.s32.totalorder %s2636_s19, %s2636_s19 }
  0x66   : > { %p2639_p2 = pnand %p2637_p13, %p2973_p7 }
  0x67   : > { %p2646_p9 = por %p2645_p10, %p2644_p8 }
  0x68   : > { %p2640_p5 = pneg %p2639_p2 }
  0x69   : > { %2378 = dma.hbm_to_vmem [thread:$0]  (!%p2963_p6), %s3375_s10, 2048, %s515_s29, [#allocation12], %s3343_s28, %s3343_s28, %s3345_s18  }
  0x6a   : > { %p2647_p11 = pnand %p2646_p9, %p2640_p5 }
  0x6c   : > { %2650 = shalt.err (!%p2647_p11)
}
  0x6d   : > { %s3376_s13 = sld [smem:[#allocation39_spill]]  ;;  %s2832_s23 = smov [#allocation17]  }
  0x6e   : > { %s559_s29 = sshll.u32 %s2832_s23, 4  ;;  %s560_s29 = int_to_ptr.vmem [resolvable:$true] %s559_s29 }
  0x6f   : > { %s2662_s21 = scalar_lea.vmem %s560_s29, 2048  ;;  %p2670_p2 = scmp.lt.s32.totalorder %s560_s29, %s560_s29 }
  0x70   : > { %p2663_p12 = scmp.ne.s32.totalorder %s560_s29, %s2662_s21  ;;  %p2671_p5 = scmp.lt.s32.totalorder %s2662_s21, %s2662_s21 }
  0x72   : > { %p2665_p0 = pnand %p2663_p12, %p2973_p7  ;;  %p2672_p8 = por %p2671_p5, %p2670_p2 }
  0x73   : > { %2384 = dma.hbm_to_vmem [thread:$0]  (!%p2963_p6), %s3376_s13, 2048, %s544_s16, [#allocation15], %s3343_s28, %s3343_s28, %s3345_s18  }
  0x74   : > { %p2666_p13 = pneg %p2665_p0 }
  0x76   : > { %p2673_p10 = pnand %p2672_p8, %p2666_p13 }
  0x78   : > { %2676 = shalt.err (!%p2673_p10)
}
  0x79   : > { %s3377_s15 = sld [smem:[#allocation40_spill]]  ;;  %s1817_s1 = sadd.s32 4294967294, %s2821_s27  }
  0x7a   : > { %s3069_s22 = sadd.s32 1, %s2821_s27   ;;  %s47_s19 = sadd.s32 1, %s2817_s26 }
  0x7b   : > { %3378 = sst [smem:[#allocation29_spill]] %s3069_s22  ;;  %s44_s20 = ssub.s32 %s2821_s27, %s3069_s22 }
  0x7c   : > { %p45_p7 = scmp.eq.s32.totalorder %s44_s20, 0  ;;  %p54_p9 = scmp.ne.s32.totalorder %s2817_s26, %s2813_s25 }
  0x7d   : > { %p55_p11 = scmp.eq.s32.totalorder %s2821_s27, 0  ;;  %p60_p12 = scmp.ne.s32.totalorder %s2813_s25, %s2809_s24 }
  0x7e   : > { %s3080_s4 = scalar_select %p45_p7, %s2817_s26, %s47_s19  }
  0x7f   : > { %2387 = dma.hbm_to_vmem [thread:$0]  (!%p2963_p6), %s3377_s15, 2048, %s560_s29, [#allocation18], %s3343_s28, %s3343_s28, %s3345_s18  }
  0x80   : > { %3379 = sst [smem:[#allocation30_spill]] %s3080_s4  ;;  %p3082_p0 = por %p55_p11, %p54_p9 }
  0x81   : > { %p3088_p6 = por %p3350_p1, %p60_p12  ;;  %p425_p13 = scmp.eq.s32.totalorder %s2949_s0, 1 }
  0x82   : > { %p431_p2 = scmp.eq.s32.totalorder %s1817_s1, 1  ;;  %p2407_p5 = scmp.lt.s32.totalorder %s2821_s27, 2 }
  0x83   : > { %s3381_s23 = scalar_select %p3088_p6, 1, 0 }
  0x84   : > { %s576_s29 = sand.u32 1, %s2817_s26   ;;  %p3095_p8 = por %p425_p13, %p54_p9 }
  0x85   : > { %p3099_p10 = por %p431_p2, %p60_p12  ;;  %s1828_s16 = sshll.u32 %s576_s29, 5 }
  0x86   : > { %s3382_s21 = scalar_select %p3095_p8, 1, 0 }
  0x87   : > { %s3383_s2 = scalar_select %p3099_p10, 1, 0 }
  0x88   : > { %s1858_s20 = sshll.u32 %s2821_s27, 9  ;;  %s3384_s18 = sld [smem:[#allocation31_spill]] }
  0x89   : > { %s580_s1 = scalar_lea.vmem [#allocation2], %s1828_s16  ;;  %p3113_p7 = pnand %p2407_p5, %p3082_p0 }
  0x8a   : > { %s587_s8 = sshll.u32 %s580_s1, 4  ;;  %s3386_s15 = sld [smem:[#allocation32_spill]]  ;;  %s3109_s8 = int_to_ptr.vmem [resolvable:$true] %s587_s8 }
  0x8b   : > { %s601_s19 = scalar_lea.vmem [#allocation5], %s1828_s16  ;;  %s3124_s26 = scalar_lea.sflag [#allocation3], %s576_s29 }
  0x8c   : > { %s3122_s4 = sshll.u32 %s601_s19, 4  ;;  %p2679_p11 = pneg %p3113_p7  ;;  %s3155_s4 = int_to_ptr.vmem [resolvable:$true] %s3122_s4 }
  0x8e   : > { %s3107_s6 = scalar_lea.hbm %s3384_s18, %s1858_s20  ;;  %s2682_s11 = scalar_lea.hbm %s3384_s18, 1024 }
  0x8f   : > { %s2677_s1 = scalar_lea.hbm %s3107_s6, 512  ;;  %p2683_p13 = scmp.lt.s32.totalorder %s3107_s6, %s3384_s18 }
  0x90   : > { %s3120_s28 = scalar_lea.hbm %s3386_s15, %s1858_s20  ;;  %p2678_p9 = scmp.ne.s32.totalorder %s3107_s6, %s2677_s1 }
  0x91   : > { %p2684_p2 = scmp.lt.s32.totalorder %s2682_s11, %s2677_s1 }
  0x92   : > { %p2680_p12 = pnand %p2679_p11, %p2678_p9 }
  0x93   : > { %p2685_p5 = por %p2684_p2, %p2683_p13 }
  0x94   : > { %p2681_p0 = pneg %p2680_p12 }
  0x96   : > { %p2686_p4 = pnand %p2685_p5, %p2681_p0 }
  0x98   : > { %2689 = shalt.err (!%p2686_p4)
}
  0x99   : > { %s2690_s29 = scalar_lea.vmem %s3109_s8, 512  ;;  %s2833_s22 = smov [#allocation2]  }
  0x9a   : > { %p2691_p1 = scmp.ne.s32.totalorder %s3109_s8, %s2690_s29  ;;  %s2695_s16 = sshll.u32 %s2833_s22, 4  ;;  %s2696_s16 = int_to_ptr.vmem [resolvable:$false] %s2695_s16 }
  0x9b   : > { %s2697_s19 = scalar_lea.vmem %s2696_s16, 1024  ;;  %p2698_p10 = scmp.lt.s32.totalorder %s3109_s8, %s2696_s16 }
  0x9c   : > { %p2693_p9 = pnand %p2691_p1, %p2679_p11  ;;  %p2699_p8 = scmp.lt.s32.totalorder %s2697_s19, %s2690_s29 }
  0x9e   : > { %p2694_p12 = pneg %p2693_p9  ;;  %p2700_p6 = por %p2699_p8, %p2698_p10 }
  0xa0   : > { %p2701_p13 = pnand %p2700_p6, %p2694_p12 }
  0xa2   : > { %2704 = shalt.err (!%p2701_p13)
}
  0xa3   : > { %s3387_s1 = smov 8   ;;  %s3388_s17 = smov 128  }
  0xa4   : > { %2391 = dma.hbm_to_vmem [thread:$0]  (!%p3113_p7), %s3107_s6, 512, %s3109_s8, %s3124_s26, %s3388_s17, %s3388_s17, %s3387_s1  }
  0xa5   : > { %s597_s11 = sand.u32 1, %s2821_s27   ;;  %s2705_s20 = scalar_lea.hbm %s3120_s28, 512 }
  0xa6   : > { %s598_s13 = scalar_lea.sflag [#allocation6], %s597_s11  ;;  %p2706_p1 = scmp.ne.s32.totalorder %s3120_s28, %s2705_s20 }
  0xa7   : > { %s2710_s16 = scalar_lea.hbm %s3386_s15, 1024  ;;  %p2711_p8 = scmp.lt.s32.totalorder %s3120_s28, %s3386_s15 }
  0xa8   : > { %p2708_p4 = pnand %p2706_p1, %p2679_p11  ;;  %p2712_p10 = scmp.lt.s32.totalorder %s2710_s16, %s2705_s20 }
  0xaa   : > { %p2709_p6 = pneg %p2708_p4  ;;  %p2713_p0 = por %p2712_p10, %p2711_p8 }
  0xac   : > { %p2714_p2 = pnand %p2713_p0, %p2709_p6 }
  0xae   : > { %2717 = shalt.err (!%p2714_p2)
}
  0xaf   : > { %s2718_s6 = scalar_lea.vmem %s3155_s4, 512  ;;  %s2834_s8 = smov [#allocation5]  }
  0xb0   : > { %p2719_p5 = scmp.ne.s32.totalorder %s3155_s4, %s2718_s6  ;;  %s2723_s26 = sshll.u32 %s2834_s8, 4  ;;  %s2724_s26 = int_to_ptr.vmem [resolvable:$false] %s2723_s26 }
  0xb1   : > { %s2725_s11 = scalar_lea.vmem %s2724_s26, 1024  ;;  %p2726_p13 = scmp.lt.s32.totalorder %s3155_s4, %s2724_s26 }
  0xb2   : > { %p2721_p9 = pnand %p2719_p5, %p2679_p11  ;;  %p2727_p1 = scmp.lt.s32.totalorder %s2725_s11, %s2718_s6 }
  0xb4   : > { %p2722_p12 = pneg %p2721_p9  ;;  %p2728_p4 = por %p2727_p1, %p2726_p13 }
  0xb6   : > { %p2729_p8 = pnand %p2728_p4, %p2722_p12 }
  0xb8   : > { %2732 = shalt.err (!%p2729_p8)
}
  0xb9   : > { %2394 = dma.hbm_to_vmem [thread:$0]  (!%p3113_p7), %s3120_s28, 512, %s3155_s4, %s598_s13, %s3388_s17, %s3388_s17, %s3387_s1  }
  0xba   : > { %620 = sbr.rel (%p2954_p3) target bundleno = 1478 (0x5c6), region = 88  ;;  %s3186_s18 = sand.u32 (!%p2954_p3), 1, %s2813_s25  }
  0xbb   : > { %s3189_s20 = sshll.u32 (!%p2954_p3), %s3186_s18, 5  ;;  %s623_s29 = scalar_lea.sflag (!%p2954_p3), [#allocation3], %s3186_s18 }
  0xbc   : > { %s3193_s10 = scalar_lea.vmem (!%p2954_p3), [#allocation2], %s3189_s20  ;;  %p3389_p11 = scmp.ne.s32.totalorder (!%p2954_p3), %s3381_s23, 0 }
  0xbf   : > { %2776 = dma.done.wait (%p3389_p11), %s623_s29, 512  }
  0xc0   : > { %2778 = vsyncadd (%p3389_p11), %s623_s29, 4294966784  ;;  %s631_s30 = sand.u32 1, %s2949_s0   ;;  %s3201_s28 = scalar_lea.vmem [#allocation5], %s3189_s20 }
  0xc1   : > { %s632_s4 = scalar_lea.sflag [#allocation6], %s631_s30 }
  0xc2   : > { %2780 = dma.done.wait (%p3389_p11), %s632_s4, 512  }
  0xc3   : > { %2782 = vsyncadd (%p3389_p11), %s632_s4, 4294966784  ;;  %p3390_p3 = scmp.eq.s32.totalorder %s2949_s0, 0 }
  0xc5   : > { %2784 = dma.done.wait (%p3390_p3), [#allocation6], 2048   ;;  %p3391_p7 = pmov %p3390_p3 }
  0xc6   : > { %p3392_p6 = pmov %p3390_p3 }
  0xc7   : > { %2786 = vsyncadd (%p3391_p7), [#allocation6], 4294965248 }
  0xc8   : > { %2788 = dma.done.wait (%p3392_p6), [#allocation9], 4096   ;;  %p3393_p10 = pmov %p3390_p3 }
  0xc9   : > { %p3394_p0 = pmov %p3390_p3 }
  0xca   : > { %2790 = vsyncadd (%p3393_p10), [#allocation9], 4294963200 }
  0xcb   : > { %2792 = dma.done.wait (%p3394_p0), [#allocation12], 4096   ;;  %p3395_p2 = pmov %p3394_p0 }
  0xcc   : > { %p3396_p5 = pmov %p3394_p0 }
  0xcd   : > { %2794 = vsyncadd (%p3395_p2), [#allocation12], 4294963200 }
  0xce   : > { %2796 = dma.done.wait (%p3396_p5), [#allocation15], 4096   ;;  %p3397_p9 = pmov %p3394_p0 }
  0xcf   : > { %p3398_p12 = pmov %p3394_p0 }
  0xd0   : > { %2798 = vsyncadd (%p3397_p9), [#allocation15], 4294963200 }
  0xd1   : > { %2800 = dma.done.wait (%p3398_p12), [#allocation18], 2048   ;;  %p3399_p13 = pmov %p3394_p0 }
  0xd2   : > { %v749_v0 = vld [vmem:[#allocation7 + $0x78] sm:$0xff]  ;;  %v748_v1 = vld [vmem:[#allocation7 + $0x70] sm:$0xff]  ;;  %v747_v2 = vld [vmem:[#allocation7 + $0x68] sm:$0xff]  ;;  %s3400_s4 = sld [smem:[#allocation41_spill]]  ;;  %s1860_s1 = sshll.u32 %s2949_s0, 9 }
  0xd3   : > { %2802 = vsyncadd (%p3399_p13), [#allocation18], 4294965248  ;;  %2021 = vmatprep.subr.mxu0 %v749_v0  ;;  %v746_v3 = vld [vmem:[#allocation7 + $0x60] sm:$0xff]  ;;  %v745_v5 = vld [vmem:[#allocation7 + $0x58] sm:$0xff]  ;;  %s3401_s22 = sld [smem:[#allocation42_spill]]  ;;  %p3402_p4 = scmp.ne.s32.totalorder %s3382_s21, 0 }
  0xd4   : > { %2022 = vmatpush3.msra.mxu0 %v749_v0  ;;  %v3228_v4 = vld [vmem:[%s3193_s10] sm:$0xff]  ;;  %v861_v6 = vld [vmem:[#allocation8 + $0x78] sm:$0xff]  ;;  %v860_v7 = vld [vmem:[#allocation8 + $0x70] sm:$0xff]  ;;  %s2835_s0 = smov [#allocation19]  }
  0xd5   : > { %2023 = vmatprep.subr.mxu0 %v748_v1  ;;  %2053 = vmatprep.mubr.f32.mxu0 %v3228_v4  ;;  %v744_v8 = vld [vmem:[#allocation7 + $0x50] sm:$0xff]  ;;  %v859_v9 = vld [vmem:[#allocation8 + $0x68] sm:$0xff]  ;;  %v858_v11 = vld [vmem:[#allocation8 + $0x60] sm:$0xff]  ;;  %s2737_s6 = sshll.u32 %s2835_s0, 4  ;;  %s2738_s6 = int_to_ptr.vmem [resolvable:$false] %s2737_s6 }
  0xd6   : > { %2024 = vmatpush3.msra.mxu0 %v748_v1  ;;  %2059 = vmatprep.subr.mxu1 %v861_v6  ;;  %v743_v10 = vld [vmem:[#allocation7 + $0x48] sm:$0xff]  ;;  %v742_v12 = vld [vmem:[#allocation7 + $0x40] sm:$0xff]  ;;  %v857_v13 = vld [vmem:[#allocation8 + $0x58] sm:$0xff]  ;;  %s2739_s8 = scalar_lea.vmem %s2738_s6, 1024 }
  0xd7   : > { %2025 = vmatprep.subr.mxu0 %v747_v2  ;;  %2060 = vmatpush3.msra.mxu1 %v861_v6  ;;  %v741_v14 = vld [vmem:[#allocation7 + $0x38] sm:$0xff]  ;;  %v856_v15 = vld [vmem:[#allocation8 + $0x50] sm:$0xff]  ;;  %v855_v17 = vld [vmem:[#allocation8 + $0x48] sm:$0xff] }
  0xd8   : > { %2026 = vmatpush3.msra.mxu0 %v747_v2  ;;  %2061 = vmatprep.subr.mxu1 %v860_v7  ;;  %v740_v16 = vld [vmem:[#allocation7 + $0x30] sm:$0xff]  ;;  %v739_v18 = vld [vmem:[#allocation7 + $0x28] sm:$0xff]  ;;  %v854_v19 = vld [vmem:[#allocation8 + $0x40] sm:$0xff] }
  0xd9   : > { %2027 = vmatprep.subr.mxu0 %v746_v3  ;;  %2062 = vmatpush3.msra.mxu1 %v860_v7  ;;  %v738_v20 = vld [vmem:[#allocation7 + $0x20] sm:$0xff]  ;;  %v853_v21 = vld [vmem:[#allocation8 + $0x38] sm:$0xff]  ;;  %v852_v23 = vld [vmem:[#allocation8 + $0x30] sm:$0xff]  ;;  %s3279_s16 = scalar_lea.hbm %s3401_s22, %s1860_s1 }
  0xda   : > { %2028 = vmatpush3.msra.mxu0 %v746_v3  ;;  %2063 = vmatprep.subr.mxu1 %v859_v9  ;;  %v737_v22 = vld [vmem:[#allocation7 + $0x18] sm:$0xff]  ;;  %v736_v24 = vld [vmem:[#allocation7 + $0x10] sm:$0xff]  ;;  %v851_v25 = vld [vmem:[#allocation8 + $0x28] sm:$0xff] }
  0xdb   : > { %2029 = vmatprep.subr.mxu0 %v745_v5  ;;  %2064 = vmatpush3.msra.mxu1 %v859_v9  ;;  %v735_v26 = vld [vmem:[#allocation7 + $0x8] sm:$0xff]  ;;  %v850_v27 = vld [vmem:[#allocation8 + $0x20] sm:$0xff]  ;;  %v3235_v30 = vld [vmem:[%s3193_s10 + $0x10] sm:$0xff] }
  0xdc   : > { %2030 = vmatpush3.msra.mxu0 %v745_v5  ;;  %2065 = vmatprep.subr.mxu1 %v858_v11  ;;  %v734_v28 = vld [vmem:[#allocation7] sm:$0xff]  ;;  %v3232_v29 = vld [vmem:[%s3193_s10 + $0x8] sm:$0xff]  ;;  %v3240_v31 = vld [vmem:[%s3193_s10 + $0x18] sm:$0xff] }
  0xdd   : > { %2031 = vmatprep.subr.mxu0 %v744_v8  ;;  %2066 = vmatpush3.msra.mxu1 %v858_v11  ;;  %v849_v32 = vld [vmem:[#allocation8 + $0x18] sm:$0xff]  ;;  %v848_v33 = vld [vmem:[#allocation8 + $0x10] sm:$0xff]  ;;  %v847_v34 = vld [vmem:[#allocation8 + $0x8] sm:$0xff] }
  0xde   : > { %2032 = vmatpush3.msra.mxu0 %v744_v8  ;;  %2067 = vmatprep.subr.mxu1 %v857_v13  ;;  %v846_v35 = vld [vmem:[#allocation8] sm:$0xff]  ;;  %v973_v36 = vld [vmem:[#allocation10 + $0x78] sm:$0xff]  ;;  %v972_v38 = vld [vmem:[#allocation10 + $0x70] sm:$0xff] }
  0xdf   : > { %2033 = vmatprep.subr.mxu0 %v743_v10  ;;  %2068 = vmatpush3.msra.mxu1 %v857_v13  ;;  %v1081_v37 = vld [vmem:[#allocation11 + $0x78] sm:$0xff]  ;;  %v971_v39 = vld [vmem:[#allocation10 + $0x68] sm:$0xff]  ;;  %v970_v40 = vld [vmem:[#allocation10 + $0x60] sm:$0xff] }
  0xe0   : > { %2034 = vmatpush3.msra.mxu0 %v743_v10  ;;  %2069 = vmatprep.subr.mxu1 %v856_v15  ;;  %v969_v41 = vld [vmem:[#allocation10 + $0x58] sm:$0xff]  ;;  %v968_v42 = vld [vmem:[#allocation10 + $0x50] sm:$0xff]  ;;  %v967_v43 = vld [vmem:[#allocation10 + $0x48] sm:$0xff] }
  0xe1   : > { %2035 = vmatprep.subr.mxu0 %v742_v12  ;;  %2070 = vmatpush3.msra.mxu1 %v856_v15  ;;  %v966_v44 = vld [vmem:[#allocation10 + $0x40] sm:$0xff]  ;;  %v965_v45 = vld [vmem:[#allocation10 + $0x38] sm:$0xff]  ;;  %v964_v46 = vld [vmem:[#allocation10 + $0x30] sm:$0xff] }
  0xe2   : > { %2036 = vmatpush3.msra.mxu0 %v742_v12  ;;  %2071 = vmatprep.subr.mxu1 %v855_v17  ;;  %v963_v47 = vld [vmem:[#allocation10 + $0x28] sm:$0xff]  ;;  %v962_v48 = vld [vmem:[#allocation10 + $0x20] sm:$0xff]  ;;  %v1080_v60 = vld [vmem:[#allocation11 + $0x70] sm:$0xff] }
  0xe3   : > { %2037 = vmatprep.subr.mxu0 %v741_v14  ;;  %2072 = vmatpush3.msra.mxu1 %v855_v17  ;;  %v1846_v49 = vld [vmem:[%s3325_s3] ss:$0 sm:$0xff]  ;;  %v1079_v62 = vld [vmem:[#allocation11 + $0x68] sm:$0xff]  ;;  %v1077_v1 = vld [vmem:[#allocation11 + $0x58] sm:$0xff] }
  0xe4   : > { %2038 = vmatpush3.msra.mxu0 %v741_v14  ;;  %2073 = vmatprep.subr.mxu1 %v854_v19  ;;  %v1078_v0 = vld [vmem:[#allocation11 + $0x60] sm:$0xff]  ;;  %v1076_v2 = vld [vmem:[#allocation11 + $0x50] sm:$0xff]  ;;  %v1075_v3 = vld [vmem:[#allocation11 + $0x48] sm:$0xff] }
  0xe5   : > { %2039 = vmatprep.subr.mxu0 %v740_v16  ;;  %2074 = vmatpush3.msra.mxu1 %v854_v19  ;;  %v1074_v5 = vld [vmem:[#allocation11 + $0x40] sm:$0xff]  ;;  %v1073_v6 = vld [vmem:[#allocation11 + $0x38] sm:$0xff]  ;;  %v1072_v7 = vld [vmem:[#allocation11 + $0x30] sm:$0xff] }
  0xe6   : > { %2040 = vmatpush3.msra.mxu0 %v740_v16  ;;  %2075 = vmatprep.subr.mxu1 %v853_v21  ;;  %v1071_v8 = vld [vmem:[#allocation11 + $0x28] sm:$0xff]  ;;  %v1070_v9 = vld [vmem:[#allocation11 + $0x20] sm:$0xff]  ;;  %v961_v10 = vld [vmem:[#allocation10 + $0x18] sm:$0xff] }
  0xe7   : > { %2041 = vmatprep.subr.mxu0 %v739_v18  ;;  %2076 = vmatpush3.msra.mxu1 %v853_v21  ;;  %v1069_v11 = vld [vmem:[#allocation11 + $0x18] sm:$0xff]  ;;  %v960_v12 = vld [vmem:[#allocation10 + $0x10] sm:$0xff]  ;;  %v959_v14 = vld [vmem:[#allocation10 + $0x8] sm:$0xff] }
  0xe8   : > { %2042 = vmatpush3.msra.mxu0 %v739_v18  ;;  %2077 = vmatprep.subr.mxu1 %v852_v23  ;;  %v1068_v13 = vld [vmem:[#allocation11 + $0x10] sm:$0xff]  ;;  %v1067_v15 = vld [vmem:[#allocation11 + $0x8] sm:$0xff]  ;;  %v958_v16 = vld [vmem:[#allocation10] sm:$0xff] }
  0xe9   : > { %2043 = vmatprep.subr.mxu0 %v738_v20  ;;  %2078 = vmatpush3.msra.mxu1 %v852_v23  ;;  %v1066_v17 = vld [vmem:[#allocation11] sm:$0xff]  ;;  %v1205_v18 = vld [vmem:[#allocation13 + $0x78] sm:$0xff] }
  0xea   : > { %2044 = vmatpush3.msra.mxu0 %v738_v20  ;;  %2079 = vmatprep.subr.mxu1 %v851_v25  ;;  %v1221_v19 = vld [vmem:[#allocation14 + $0x78] sm:$0xff]  ;;  %v1847_v20 = vld [vmem:[%s3327_s5] ss:$0 sm:$0xff] }
  0xeb   : > { %2045 = vmatprep.subr.mxu0 %v737_v22  ;;  %2080 = vmatpush3.msra.mxu1 %v851_v25 }
  0xec   : > { %2046 = vmatpush3.msra.mxu0 %v737_v22  ;;  %2081 = vmatprep.subr.mxu1 %v850_v27 }
  0xed   : > { %2047 = vmatprep.subr.mxu0 %v736_v24  ;;  %2082 = vmatpush3.msra.mxu1 %v850_v27 }
  0xee   : > { %2048 = vmatpush3.msra.mxu0 %v736_v24  ;;  %2083 = vmatprep.subr.mxu1 %v849_v32 }
  0xef   : > { %2049 = vmatprep.subr.mxu0 %v735_v26  ;;  %2084 = vmatpush3.msra.mxu1 %v849_v32 }
  0xf0   : > { %2050 = vmatpush3.msra.mxu0 %v735_v26  ;;  %2085 = vmatprep.subr.mxu1 %v848_v33 }
  0xf1   : > { %2051 = vmatprep.subr.mxu0 %v734_v28  ;;  %2086 = vmatpush3.msra.mxu1 %v848_v33 }
  0xf2   : > { %2052 = vmatpush3.msra.mxu0 %v734_v28  ;;  %2087 = vmatprep.subr.mxu1 %v847_v34 }
  0xf3   : > { %2054 = vmatmul.mubr.f32.vlgmr.msra.gmra.mxu0 %v3232_v29  ;;  %2088 = vmatpush3.msra.mxu1 %v847_v34  ;;  %v1204_v34 = vld [vmem:[#allocation13 + $0x70] sm:$0xff] }
  0xf4   : > { %2056 = vmatprep.mubr.f32.mxu0 %v3235_v30  ;;  %2089 = vmatprep.subr.mxu1 %v846_v35 }
  0xf5   : > { %2090 = vmatpush3.msra.mxu1 %v846_v35  ;;  %2097 = vmatprep.subr.mxu0 %v973_v36  ;;  %v1220_v35 = vld [vmem:[#allocation14 + $0x70] sm:$0xff] }
  0xf6   : > { %2135 = vmatprep.subr.mxu1 %v1081_v37  ;;  %2098 = vmatpush3.msra.mxu0 %v973_v36 }
  0xf7   : > { %2057 = vmatmul.mubr.f32.gmra.mxu0 %v3240_v31  ;;  %2099 = vmatprep.subr.mxu0 %v972_v38 }
  0xf8   : > { %2100 = vmatpush3.msra.mxu0 %v972_v38  ;;  %v1203_v38 = vld [vmem:[#allocation13 + $0x68] sm:$0xff] }
  0xf9   : > { %2101 = vmatprep.subr.mxu0 %v971_v39 }
  0xfa   : > { %2102 = vmatpush3.msra.mxu0 %v971_v39  ;;  %v1219_v39 = vld [vmem:[#allocation14 + $0x68] sm:$0xff] }
  0xfb   : > { %2103 = vmatprep.subr.mxu0 %v970_v40 }
  0xfc   : > { %2104 = vmatpush3.msra.mxu0 %v970_v40  ;;  %v1202_v40 = vld [vmem:[#allocation13 + $0x60] sm:$0xff] }
  0xfd   : > { %2105 = vmatprep.subr.mxu0 %v969_v41 }
  0xfe   : > { %2106 = vmatpush3.msra.mxu0 %v969_v41  ;;  %v1218_v41 = vld [vmem:[#allocation14 + $0x60] sm:$0xff] }
  0xff   : > { %2107 = vmatprep.subr.mxu0 %v968_v42 }
 0x100   : > { %2108 = vmatpush3.msra.mxu0 %v968_v42  ;;  %v1201_v42 = vld [vmem:[#allocation13 + $0x58] sm:$0xff] }
 0x101   : > { %2109 = vmatprep.subr.mxu0 %v967_v43 }
 0x102   : > { %2110 = vmatpush3.msra.mxu0 %v967_v43  ;;  %v1217_v43 = vld [vmem:[#allocation14 + $0x58] sm:$0xff] }
 0x103   : > { %2111 = vmatprep.subr.mxu0 %v966_v44 }
 0x104   : > { %2112 = vmatpush3.msra.mxu0 %v966_v44  ;;  %v1200_v44 = vld [vmem:[#allocation13 + $0x50] sm:$0xff] }
 0x105   : > { %2113 = vmatprep.subr.mxu0 %v965_v45 }
 0x106   : > { %2114 = vmatpush3.msra.mxu0 %v965_v45  ;;  %v1216_v45 = vld [vmem:[#allocation14 + $0x50] sm:$0xff] }
 0x107   : > { %2115 = vmatprep.subr.mxu0 %v964_v46 }
 0x108   : > { %2116 = vmatpush3.msra.mxu0 %v964_v46  ;;  %v1199_v46 = vld [vmem:[#allocation13 + $0x48] sm:$0xff] }
 0x109   : > { %2117 = vmatprep.subr.mxu0 %v963_v47 }
 0x10a   : > { %2118 = vmatpush3.msra.mxu0 %v963_v47  ;;  %v1198_v47 = vld [vmem:[#allocation13 + $0x40] sm:$0xff] }
 0x10b   : > { %2119 = vmatprep.subr.mxu0 %v962_v48 }
 0x10c   : > { %2120 = vmatpush3.msra.mxu0 %v962_v48  ;;  %v1214_v48 = vld [vmem:[#allocation14 + $0x40] sm:$0xff] }
 0x10d   : > { %2121 = vmatprep.subr.mxu0 %v961_v10 }
 0x10e   : > { %2122 = vmatpush3.msra.mxu0 %v961_v10 }
 0x10f   : > { %2123 = vmatprep.subr.mxu0 %v960_v12 }
 0x110   : > { %2124 = vmatpush3.msra.mxu0 %v960_v12 }
 0x111   : > { %2125 = vmatprep.subr.mxu0 %v959_v14 }
 0x112   : > { %2126 = vmatpush3.msra.mxu0 %v959_v14 }
 0x113   : > { %2127 = vmatprep.subr.mxu0 %v958_v16 }
 0x114   : > { %2128 = vmatpush3.msra.mxu0 %v958_v16 }
 0x115   : > { %2173 = vmatprep.subr.mxu0 %v1221_v19 }
 0x1b3   : > { %v2055_v50 = vpop.f32.mrf.mxu0 }
 0x1b4   : > { %v829_v51 = vadd.f32 %v2055_v50, %v1846_v49  ;;  %v1213_v50 = vld [vmem:[#allocation14 + $0x38] sm:$0xff] }
 0x1b5   : > { %v823_v52 = vpop.f32.mrf.mxu0 }
 0x1b6   : > { %v824_v53 = vadd.f32 %v1846_v49, %v823_v52  ;;  %v843_v56 = vmax.f32 %v829_v51, 0.0  ;;  %v1196_v51 = vld [vmem:[#allocation13 + $0x30] sm:$0xff] }
 0x1b7   : > { %v2058_v54 = vpop.f32.mrf.mxu0  ;;  %v1212_v52 = vld [vmem:[#allocation14 + $0x30] sm:$0xff] }
 0x1b8   : > { %v842_v55 = vmax.f32 %v824_v53, 0.0  ;;  %v839_v57 = vadd.f32 %v2058_v54, %v1846_v49  ;;  %v1195_v53 = vld [vmem:[#allocation13 + $0x28] sm:$0xff] }
 0x1b9   : > { %v833_v58 = vpop.f32.mrf.mxu0  ;;  %v1211_v54 = vld [vmem:[#allocation14 + $0x28] sm:$0xff] }
 0x1ba   : > { %v834_v59 = vadd.f32 %v1846_v49, %v833_v58  ;;  %2091 = vmatprep.mubr.f32.mxu1 %v842_v55  ;;  %v845_v63 = vmax.f32 %v839_v57, 0.0  ;;  %v1197_v49 = vld [vmem:[#allocation13 + $0x38] sm:$0xff]  ;;  %v1194_v55 = vld [vmem:[#allocation13 + $0x20] sm:$0xff] }
 0x1bb   : > { %2092 = vmatmul.mubr.f32.vlgmr.msra.gmra.mxu1 %v843_v56  ;;  %v1210_v56 = vld [vmem:[#allocation14 + $0x20] sm:$0xff]  ;;  %v1193_v57 = vld [vmem:[#allocation13 + $0x18] sm:$0xff] }
 0x1bc   : > { %v844_v61 = vmax.f32 %v834_v59, 0.0  ;;  %2136 = vmatpush3.msra.mxu1 %v1081_v37  ;;  %v1209_v58 = vld [vmem:[#allocation14 + $0x18] sm:$0xff]  ;;  %v1192_v59 = vld [vmem:[#allocation13 + $0x10] sm:$0xff] }
 0x1bd   : > { %2137 = vmatprep.subr.mxu1 %v1080_v60 }
 0x1be   : > { %2094 = vmatprep.mubr.f32.mxu1 %v844_v61  ;;  %2138 = vmatpush3.msra.mxu1 %v1080_v60  ;;  %v1208_v60 = vld [vmem:[#allocation14 + $0x10] sm:$0xff]  ;;  %v1191_v61 = vld [vmem:[#allocation13 + $0x8] sm:$0xff] }
 0x1bf   : > { %2095 = vmatmul.mubr.f32.gmra.mxu1 %v845_v63  ;;  %2139 = vmatprep.subr.mxu1 %v1079_v62  ;;  %v1190_v63 = vld [vmem:[#allocation13] sm:$0xff] }
 0x1c0   : > { %2140 = vmatpush3.msra.mxu1 %v1079_v62  ;;  %v1207_v62 = vld [vmem:[#allocation14 + $0x8] sm:$0xff] }
 0x1c1   : > { %2141 = vmatprep.subr.mxu1 %v1078_v0 }
 0x1c2   : > { %2142 = vmatpush3.msra.mxu1 %v1078_v0  ;;  %v1206_v0 = vld [vmem:[#allocation14] sm:$0xff] }
 0x1c3   : > { %2143 = vmatprep.subr.mxu1 %v1077_v1 }
 0x1c4   : > { %2144 = vmatpush3.msra.mxu1 %v1077_v1  ;;  %v1422_v1 = vld [vmem:[#allocation16 + $0x78] sm:$0xff] }
 0x1c5   : > { %2145 = vmatprep.subr.mxu1 %v1076_v2 }
 0x1c6   : > { %2146 = vmatpush3.msra.mxu1 %v1076_v2  ;;  %v1849_v2 = vld [vmem:[%s3331_s9] ss:$0 sm:$0xff] }
 0x1c7   : > { %2147 = vmatprep.subr.mxu1 %v1075_v3 }
 0x1c8   : > { %2148 = vmatpush3.msra.mxu1 %v1075_v3 }
 0x1c9   : > { %2149 = vmatprep.subr.mxu1 %v1074_v5 }
 0x1ca   : > { %2150 = vmatpush3.msra.mxu1 %v1074_v5 }
 0x1cb   : > { %2151 = vmatprep.subr.mxu1 %v1073_v6 }
 0x1cc   : > { %2152 = vmatpush3.msra.mxu1 %v1073_v6 }
 0x1cd   : > { %2153 = vmatprep.subr.mxu1 %v1072_v7 }
 0x1ce   : > { %2154 = vmatpush3.msra.mxu1 %v1072_v7 }
 0x1cf   : > { %2155 = vmatprep.subr.mxu1 %v1071_v8 }
 0x1d0   : > { %2156 = vmatpush3.msra.mxu1 %v1071_v8 }
 0x1d1   : > { %2157 = vmatprep.subr.mxu1 %v1070_v9 }
 0x1d2   : > { %2158 = vmatpush3.msra.mxu1 %v1070_v9 }
 0x1d3   : > { %2159 = vmatprep.subr.mxu1 %v1069_v11 }
 0x1d4   : > { %2160 = vmatpush3.msra.mxu1 %v1069_v11 }
 0x1d5   : > { %2161 = vmatprep.subr.mxu1 %v1068_v13 }
 0x1d6   : > { %2162 = vmatpush3.msra.mxu1 %v1068_v13 }
 0x1d7   : > { %2163 = vmatprep.subr.mxu1 %v1067_v15 }
 0x1d8   : > { %2164 = vmatpush3.msra.mxu1 %v1067_v15  ;;  %v731_v15 = vld [vmem:[%s3201_s28 + $0x8] sm:$0xff] }
 0x1d9   : > { %2165 = vmatprep.subr.mxu1 %v1066_v17 }
 0x1da   : > { %2166 = vmatpush3.msra.mxu1 %v1066_v17 }
 0x1db   : > { %2211 = vmatprep.subr.mxu1 %v1205_v18 }
 0x27b   : > { %v2093_v21 = vpop.f32.mrf.mxu1 }
 0x27c   : > { %v941_v22 = vadd.f32 %v2093_v21, %v1847_v20 }
 0x27d   : > { %v935_v23 = vpop.f32.mrf.mxu1 }
 0x27e   : > { %v936_v24 = vadd.f32 %v1847_v20, %v935_v23  ;;  %v955_v27 = vmax.f32 %v941_v22, 0.0 }
 0x27f   : > { %v2096_v25 = vpop.f32.mrf.mxu1 }
 0x280   : > { %v954_v26 = vmax.f32 %v936_v24, 0.0  ;;  %v951_v28 = vadd.f32 %v2096_v25, %v1847_v20  ;;  %v733_v24 = vld [vmem:[%s3201_s28 + $0x18] sm:$0xff] }
 0x281   : > { %v945_v32 = vpop.f32.mrf.mxu1 }
 0x282   : > { %v946_v33 = vadd.f32 %v1847_v20, %v945_v32  ;;  %2129 = vmatprep.mubr.f32.mxu0 %v954_v26  ;;  %2167 = vmatprep.mubr.f32.mxu1 %v954_v26  ;;  %v957_v37 = vmax.f32 %v951_v28, 0.0  ;;  %v732_v28 = vld [vmem:[%s3201_s28 + $0x10] sm:$0xff] }
 0x283   : > { %2130 = vmatmul.mubr.f32.vlgmr.msra.gmra.mxu0 %v955_v27  ;;  %2168 = vmatmul.mubr.f32.vlgmr.msra.gmra.mxu1 %v955_v27 }
 0x284   : > { %v956_v36 = vmax.f32 %v946_v33, 0.0  ;;  %2212 = vmatpush3.msra.mxu1 %v1205_v18  ;;  %2174 = vmatpush3.msra.mxu0 %v1221_v19  ;;  %v730_v18 = vld [vmem:[%s3201_s28] sm:$0xff]  ;;  %s722_s28 = scalar_lea.vmem [#allocation19], %s3189_s20  ;;  %s1632_s20 = scalar_lea.sflag [#allocation4], %s3186_s18 }
 0x285   : > { %2213 = vmatprep.subr.mxu1 %v1204_v34  ;;  %2175 = vmatprep.subr.mxu0 %v1220_v35  ;;  %v1848_v19 = vld [vmem:[%s3329_s7] ss:$0 sm:$0xff]  ;;  %s1645_s23 = sshll.u32 %s722_s28, 4  ;;  %s3274_s23 = int_to_ptr.vmem [resolvable:$true] %s1645_s23 }
 0x286   : > { %2132 = vmatprep.mubr.f32.mxu0 %v956_v36  ;;  %2170 = vmatprep.mubr.f32.mxu1 %v956_v36  ;;  %s2733_s19 = scalar_lea.vmem %s3274_s23, 512  ;;  %p2740_p3 = scmp.lt.s32.totalorder %s3274_s23, %s2738_s6 }
 0x287   : > { %2133 = vmatmul.mubr.f32.gmra.mxu0 %v957_v37  ;;  %2171 = vmatmul.mubr.f32.gmra.mxu1 %v957_v37  ;;  %p2734_p1 = scmp.ne.s32.totalorder %s3274_s23, %s2733_s19  ;;  %p2741_p7 = scmp.lt.s32.totalorder %s2739_s8, %s2733_s19 }
 0x288   : > { %2214 = vmatpush3.msra.mxu1 %v1204_v34  ;;  %2176 = vmatpush3.msra.mxu0 %v1220_v35 }
 0x289   : > { %2215 = vmatprep.subr.mxu1 %v1203_v38  ;;  %2177 = vmatprep.subr.mxu0 %v1219_v39  ;;  %p2735_p8 = pnand %p2734_p1, %p3402_p4  ;;  %p2742_p6 = por %p2741_p7, %p2740_p3 }
 0x28a   : > { %2216 = vmatpush3.msra.mxu1 %v1203_v38  ;;  %2178 = vmatpush3.msra.mxu0 %v1219_v39  ;;  %v1421_v38 = vld [vmem:[#allocation16 + $0x70] sm:$0xff] }
 0x28b   : > { %2217 = vmatprep.subr.mxu1 %v1202_v40  ;;  %2243 = vmatprep.mubr.f32.mxu1 %v3228_v4  ;;  %v1215_v4 = vld [vmem:[#allocation14 + $0x48] sm:$0xff]  ;;  %p2736_p11 = pneg %p2735_p8 }
 0x28c   : > { %2218 = vmatpush3.msra.mxu1 %v1202_v40  ;;  %2179 = vmatprep.subr.mxu0 %v1218_v41 }
 0x28d   : > { %2219 = vmatprep.subr.mxu1 %v1201_v42  ;;  %2180 = vmatpush3.msra.mxu0 %v1218_v41  ;;  %v1420_v41 = vld [vmem:[#allocation16 + $0x68] sm:$0xff]  ;;  %p2743_p10 = pnand %p2742_p6, %p2736_p11 }
 0x28e   : > { %2220 = vmatpush3.msra.mxu1 %v1201_v42  ;;  %2181 = vmatprep.subr.mxu0 %v1217_v43 }
 0x28f   : > { %2221 = vmatprep.subr.mxu1 %v1200_v44  ;;  %2182 = vmatpush3.msra.mxu0 %v1217_v43  ;;  %v1419_v43 = vld [vmem:[#allocation16 + $0x60] sm:$0xff] }
 0x290   : > { %2222 = vmatpush3.msra.mxu1 %v1200_v44  ;;  %2183 = vmatprep.subr.mxu0 %v1216_v45  ;;  %v1418_v44 = vld [vmem:[#allocation16 + $0x58] sm:$0xff] }
 0x291   : > { %2223 = vmatprep.subr.mxu1 %v1199_v46  ;;  %2184 = vmatpush3.msra.mxu0 %v1216_v45  ;;  %v1417_v45 = vld [vmem:[#allocation16 + $0x50] sm:$0xff] }
 0x292   : > { %2224 = vmatpush3.msra.mxu1 %v1199_v46  ;;  %2185 = vmatprep.subr.mxu0 %v1215_v4  ;;  %v1416_v46 = vld [vmem:[#allocation16 + $0x48] sm:$0xff] }
 0x293   : > { %2225 = vmatprep.subr.mxu1 %v1198_v47  ;;  %2186 = vmatpush3.msra.mxu0 %v1215_v4  ;;  %v1415_v4 = vld [vmem:[#allocation16 + $0x40] sm:$0xff] }
 0x294   : > { %2226 = vmatpush3.msra.mxu1 %v1198_v47  ;;  %2187 = vmatprep.subr.mxu0 %v1214_v48  ;;  %v1414_v47 = vld [vmem:[#allocation16 + $0x38] sm:$0xff] }
 0x295   : > { %2227 = vmatprep.subr.mxu1 %v1197_v49  ;;  %2188 = vmatpush3.msra.mxu0 %v1214_v48  ;;  %v1413_v48 = vld [vmem:[#allocation16 + $0x30] sm:$0xff] }
 0x296   : > { %2228 = vmatpush3.msra.mxu1 %v1197_v49  ;;  %2189 = vmatprep.subr.mxu0 %v1213_v50  ;;  %v1412_v49 = vld [vmem:[#allocation16 + $0x28] sm:$0xff] }
 0x297   : > { %2229 = vmatprep.subr.mxu1 %v1196_v51  ;;  %2190 = vmatpush3.msra.mxu0 %v1213_v50  ;;  %v1411_v50 = vld [vmem:[#allocation16 + $0x20] sm:$0xff] }
 0x298   : > { %2230 = vmatpush3.msra.mxu1 %v1196_v51  ;;  %2191 = vmatprep.subr.mxu0 %v1212_v52  ;;  %v1410_v51 = vld [vmem:[#allocation16 + $0x18] sm:$0xff] }
 0x299   : > { %2231 = vmatprep.subr.mxu1 %v1195_v53  ;;  %2192 = vmatpush3.msra.mxu0 %v1212_v52  ;;  %v1409_v52 = vld [vmem:[#allocation16 + $0x10] sm:$0xff] }
 0x29a   : > { %2232 = vmatpush3.msra.mxu1 %v1195_v53  ;;  %2193 = vmatprep.subr.mxu0 %v1211_v54  ;;  %v1408_v53 = vld [vmem:[#allocation16 + $0x8] sm:$0xff] }
 0x29b   : > { %2233 = vmatprep.subr.mxu1 %v1194_v55  ;;  %2194 = vmatpush3.msra.mxu0 %v1211_v54  ;;  %v1407_v54 = vld [vmem:[#allocation16] sm:$0xff] }
 0x29c   : > { %2234 = vmatpush3.msra.mxu1 %v1194_v55  ;;  %2195 = vmatprep.subr.mxu0 %v1210_v56  ;;  %v1534_v55 = vld [vmem:[#allocation17 + $0x78] sm:$0xff] }
 0x29d   : > { %2235 = vmatprep.subr.mxu1 %v1193_v57  ;;  %2196 = vmatpush3.msra.mxu0 %v1210_v56  ;;  %v1533_v56 = vld [vmem:[#allocation17 + $0x70] sm:$0xff] }
 0x29e   : > { %2236 = vmatpush3.msra.mxu1 %v1193_v57  ;;  %2197 = vmatprep.subr.mxu0 %v1209_v58  ;;  %v1532_v57 = vld [vmem:[#allocation17 + $0x68] sm:$0xff] }
 0x29f   : > { %2237 = vmatprep.subr.mxu1 %v1192_v59  ;;  %2198 = vmatpush3.msra.mxu0 %v1209_v58  ;;  %v1531_v58 = vld [vmem:[#allocation17 + $0x60] sm:$0xff] }
 0x2a0   : > { %2238 = vmatpush3.msra.mxu1 %v1192_v59  ;;  %2199 = vmatprep.subr.mxu0 %v1208_v60  ;;  %v1530_v59 = vld [vmem:[#allocation17 + $0x58] sm:$0xff] }
 0x2a1   : > { %2239 = vmatprep.subr.mxu1 %v1191_v61  ;;  %2200 = vmatpush3.msra.mxu0 %v1208_v60  ;;  %v1529_v60 = vld [vmem:[#allocation17 + $0x50] sm:$0xff] }
 0x2a2   : > { %2240 = vmatpush3.msra.mxu1 %v1191_v61  ;;  %2201 = vmatprep.subr.mxu0 %v1207_v62  ;;  %v1528_v61 = vld [vmem:[#allocation17 + $0x48] sm:$0xff] }
 0x2a3   : > { %2241 = vmatprep.subr.mxu1 %v1190_v63  ;;  %2202 = vmatpush3.msra.mxu0 %v1207_v62  ;;  %v1527_v62 = vld [vmem:[#allocation17 + $0x40] sm:$0xff] }
 0x2a4   : > { %2242 = vmatpush3.msra.mxu1 %v1190_v63  ;;  %2203 = vmatprep.subr.mxu0 %v1206_v0  ;;  %v1526_v63 = vld [vmem:[#allocation17 + $0x38] sm:$0xff] }
 0x2a5   : > { %2244 = vmatmul.mubr.f32.vlgmr.msra.gmra.mxu1 %v3232_v29  ;;  %2204 = vmatpush3.msra.mxu0 %v1206_v0  ;;  %v1525_v0 = vld [vmem:[#allocation17 + $0x30] sm:$0xff] }
 0x2a6   : > { %2246 = vmatprep.mubr.f32.mxu1 %v3235_v30  ;;  %2249 = vmatprep.subr.mxu0 %v1422_v1 }
 0x2a7   : > { %2287 = vmatprep.subr.mxu1 %v1534_v55 }
 0x2a8   : > { %2288 = vmatpush3.msra.mxu1 %v1534_v55 }
 0x2a9   : > { %2247 = vmatmul.mubr.f32.gmra.mxu1 %v3240_v31  ;;  %2289 = vmatprep.subr.mxu1 %v1533_v56 }
 0x2aa   : > { %2290 = vmatpush3.msra.mxu1 %v1533_v56 }
 0x2ab   : > { %2291 = vmatprep.subr.mxu1 %v1532_v57 }
 0x2ac   : > { %2292 = vmatpush3.msra.mxu1 %v1532_v57 }
 0x2ad   : > { %2293 = vmatprep.subr.mxu1 %v1531_v58 }
 0x2ae   : > { %2294 = vmatpush3.msra.mxu1 %v1531_v58 }
 0x2af   : > { %2295 = vmatprep.subr.mxu1 %v1530_v59 }
 0x2b0   : > { %2296 = vmatpush3.msra.mxu1 %v1530_v59 }
 0x2b1   : > { %2297 = vmatprep.subr.mxu1 %v1529_v60 }
 0x2b2   : > { %2298 = vmatpush3.msra.mxu1 %v1529_v60 }
 0x2b3   : > { %2299 = vmatprep.subr.mxu1 %v1528_v61 }
 0x2b4   : > { %2300 = vmatpush3.msra.mxu1 %v1528_v61 }
 0x2b5   : > { %2301 = vmatprep.subr.mxu1 %v1527_v62 }
 0x2b6   : > { %2302 = vmatpush3.msra.mxu1 %v1527_v62 }
 0x2b7   : > { %2303 = vmatprep.subr.mxu1 %v1526_v63 }
 0x2b8   : > { %2304 = vmatpush3.msra.mxu1 %v1526_v63 }
 0x2b9   : > { %2305 = vmatprep.subr.mxu1 %v1525_v0 }
 0x2ba   : > { %2306 = vmatpush3.msra.mxu1 %v1525_v0 }
 0x343   : > { %v2169_v3 = vpop.f32.mrf.mxu1  ;;  %v2131_v13 = vpop.f32.mrf.mxu0 }
 0x344   : > { %v1161_v5 = vadd.f32 %v2169_v3, %v1849_v2  ;;  %v1053_v26 = vadd.f32 %v2131_v13, %v1848_v19 }
 0x345   : > { %v1155_v6 = vpop.f32.mrf.mxu1  ;;  %v1047_v14 = vpop.f32.mrf.mxu0 }
 0x346   : > { %v1176_v7 = vmul.f32 1.442695, %v1161_v5  ;;  %v1156_v8 = vadd.f32 %v1849_v2, %v1155_v6  ;;  %v1048_v22 = vadd.f32 %v1848_v19, %v1047_v14 }
 0x347   : > { %v2172_v9 = vpop.f32.mrf.mxu1  ;;  %v2134_v17 = vpop.f32.mrf.mxu0 }
 0x348   : > { %2461 = vpow2.f32 %v1176_v7  ;;  %v1174_v29 = vmul.f32 1.442695, %v1156_v8  ;;  %v1171_v10 = vadd.f32 %v2172_v9, %v1849_v2  ;;  %v1063_v39 = vadd.f32 %v2134_v17, %v1848_v19  ;;  %v1850_v8 = vld [vmem:[%s3334_s12] ss:$0 sm:$0xff] }
 0x349   : > { %v1165_v30 = vpop.f32.mrf.mxu1  ;;  %v1057_v27 = vpop.f32.mrf.mxu0 }
 0x34a   : > { %2463 = vpow2.f32 %v1174_v29  ;;  %v1180_v31 = vmul.f32 1.442695, %v1171_v10  ;;  %v1166_v11 = vadd.f32 %v1849_v2, %v1165_v30  ;;  %v1058_v36 = vadd.f32 %v1848_v19, %v1057_v27  ;;  %v1523_v2 = vld [vmem:[#allocation17 + $0x20] sm:$0xff] }
 0x34c   : > { %2465 = vpow2.f32 %v1180_v31  ;;  %v1178_v12 = vmul.f32 1.442695, %v1166_v11 }
 0x34e   : > { %2467 = vpow2.f32 %v1178_v12 }
 0x355   : > { %v2462_v16 = vpop.eup %2461 }
 0x356   : > { %v1183_v21 = vmul.f32 %v2462_v16, %v731_v15 }
 0x357   : > { %v2464_v20 = vpop.eup %2463 }
 0x358   : > { %v1182_v23 = vmul.f32 %v2464_v20, %v730_v18  ;;  %v1187_v34 = vadd.f32 %v1183_v21, %v1053_v26  ;;  %v1851_v26 = vld [vmem:[%s3336_s14] ss:$0 sm:$0xff] }
 0x359   : > { %v2466_v25 = vpop.eup %2465 }
 0x35a   : > { %v1186_v32 = vadd.f32 %v1182_v23, %v1048_v22  ;;  %v1185_v35 = vmul.f32 %v2466_v25, %v733_v24  ;;  %v1522_v22 = vld [vmem:[#allocation17 + $0x18] sm:$0xff]  ;;  %v1521_v23 = vld [vmem:[#allocation17 + $0x10] sm:$0xff]  ;;  %v1520_v24 = vld [vmem:[#allocation17 + $0x8] sm:$0xff] }
 0x35b   : > { %v2468_v33 = vpop.eup %2467  ;;  %v1519_v25 = vld [vmem:[#allocation17] sm:$0xff] }
 0x35c   : > { %2205 = vmatprep.mubr.f32.mxu0 %v1186_v32  ;;  %v1184_v37 = vmul.f32 %v2468_v33, %v732_v28  ;;  %v1189_v42 = vadd.f32 %v1185_v35, %v1063_v39 }
 0x35d   : > { %2206 = vmatmul.mubr.f32.vlgmr.msra.gmra.mxu0 %v1187_v34 }
 0x35e   : > { %v1188_v40 = vadd.f32 %v1184_v37, %v1058_v36  ;;  %2250 = vmatpush3.msra.mxu0 %v1422_v1  ;;  %v1524_v1 = vld [vmem:[#allocation17 + $0x28] sm:$0xff] }
 0x35f   : > { %2251 = vmatprep.subr.mxu0 %v1421_v38  ;;  %2307 = vmatprep.subr.mxu1 %v1524_v1 }
 0x360   : > { %2208 = vmatprep.mubr.f32.mxu0 %v1188_v40  ;;  %2252 = vmatpush3.msra.mxu0 %v1421_v38 }
 0x361   : > { %2209 = vmatmul.mubr.f32.gmra.mxu0 %v1189_v42  ;;  %2253 = vmatprep.subr.mxu0 %v1420_v41  ;;  %v1852_v42 = vld [vmem:[%s3400_s4] ss:$0 sm:$0xff] }
 0x362   : > { %2254 = vmatpush3.msra.mxu0 %v1420_v41  ;;  %2308 = vmatpush3.msra.mxu1 %v1524_v1 }
 0x363   : > { %2255 = vmatprep.subr.mxu0 %v1419_v43  ;;  %2309 = vmatprep.subr.mxu1 %v1523_v2 }
 0x364   : > { %2256 = vmatpush3.msra.mxu0 %v1419_v43  ;;  %2310 = vmatpush3.msra.mxu1 %v1523_v2 }
 0x365   : > { %2257 = vmatprep.subr.mxu0 %v1418_v44  ;;  %v2245_v3 = vpop.f32.mrf.mxu1  ;;  %2311 = vmatprep.subr.mxu1 %v1522_v22 }
 0x366   : > { %2258 = vmatpush3.msra.mxu0 %v1418_v44  ;;  %2312 = vmatpush3.msra.mxu1 %v1522_v22 }
 0x367   : > { %2259 = vmatprep.subr.mxu0 %v1417_v45  ;;  %v1373_v5 = vpop.f32.mrf.mxu1  ;;  %2313 = vmatprep.subr.mxu1 %v1521_v23 }
 0x368   : > { %2260 = vmatpush3.msra.mxu0 %v1417_v45  ;;  %2314 = vmatpush3.msra.mxu1 %v1521_v23 }
 0x369   : > { %2261 = vmatprep.subr.mxu0 %v1416_v46  ;;  %v2248_v29 = vpop.f32.mrf.mxu1  ;;  %2315 = vmatprep.subr.mxu1 %v1520_v24 }
 0x36a   : > { %2262 = vmatpush3.msra.mxu0 %v1416_v46  ;;  %2316 = vmatpush3.msra.mxu1 %v1520_v24 }
 0x36b   : > { %2263 = vmatprep.subr.mxu0 %v1415_v4  ;;  %v1383_v13 = vpop.f32.mrf.mxu1  ;;  %2317 = vmatprep.subr.mxu1 %v1519_v25 }
 0x36c   : > { %2264 = vmatpush3.msra.mxu0 %v1415_v4  ;;  %2318 = vmatpush3.msra.mxu1 %v1519_v25 }
 0x36d   : > { %2265 = vmatprep.subr.mxu0 %v1414_v47 }
 0x36e   : > { %2266 = vmatpush3.msra.mxu0 %v1414_v47 }
 0x36f   : > { %2267 = vmatprep.subr.mxu0 %v1413_v48 }
 0x370   : > { %2268 = vmatpush3.msra.mxu0 %v1413_v48 }
 0x371   : > { %2269 = vmatprep.subr.mxu0 %v1412_v49 }
 0x372   : > { %2270 = vmatpush3.msra.mxu0 %v1412_v49 }
 0x373   : > { %2271 = vmatprep.subr.mxu0 %v1411_v50 }
 0x374   : > { %2272 = vmatpush3.msra.mxu0 %v1411_v50 }
 0x375   : > { %2273 = vmatprep.subr.mxu0 %v1410_v51 }
 0x376   : > { %2274 = vmatpush3.msra.mxu0 %v1410_v51 }
 0x377   : > { %2275 = vmatprep.subr.mxu0 %v1409_v52 }
 0x378   : > { %2276 = vmatpush3.msra.mxu0 %v1409_v52 }
 0x379   : > { %2277 = vmatprep.subr.mxu0 %v1408_v53 }
 0x37a   : > { %2278 = vmatpush3.msra.mxu0 %v1408_v53 }
 0x37b   : > { %2279 = vmatprep.subr.mxu0 %v1407_v54 }
 0x37c   : > { %2280 = vmatpush3.msra.mxu0 %v1407_v54 }
 0x41d   : > { %v2207_v6 = vpop.f32.mrf.mxu0 }
 0x41e   : > { %v1379_v7 = vadd.f32 %v2245_v3, %v2207_v6 }
 0x41f   : > { %v1288_v9 = vpop.f32.mrf.mxu0 }
 0x420   : > { %v1374_v10 = vadd.f32 %v1373_v5, %v1288_v9  ;;  %v1400_v30 = vadd.f32 %v1850_v8, %v1379_v7 }
 0x421   : > { %v2210_v31 = vpop.f32.mrf.mxu0 }
 0x422   : > { %v1399_v11 = vadd.f32 %v1850_v8, %v1374_v10  ;;  %v1389_v12 = vadd.f32 %v2248_v29, %v2210_v31  ;;  %v1404_v17 = vmax.f32 %v1400_v30, 0.0 }
 0x423   : > { %v1298_v14 = vpop.f32.mrf.mxu0 }
 0x424   : > { %v1403_v15 = vmax.f32 %v1399_v11, 0.0  ;;  %v1384_v16 = vadd.f32 %v1383_v13, %v1298_v14  ;;  %v1402_v18 = vadd.f32 %v1850_v8, %v1389_v12 }
 0x426   : > { %v1401_v19 = vadd.f32 %v1850_v8, %v1384_v16  ;;  %2281 = vmatprep.mubr.f32.mxu0 %v1403_v15  ;;  %v1406_v21 = vmax.f32 %v1402_v18, 0.0 }
 0x427   : > { %2282 = vmatmul.mubr.f32.vlgmr.msra.gmra.mxu0 %v1404_v17 }
 0x428   : > { %v1405_v20 = vmax.f32 %v1401_v19, 0.0 }
 0x42a   : > { %2284 = vmatprep.mubr.f32.mxu0 %v1405_v20 }
 0x42b   : > { %2285 = vmatmul.mubr.f32.gmra.mxu0 %v1406_v21 }
 0x4e7   : > { %v2283_v27 = vpop.f32.mrf.mxu0 }
 0x4e8   : > { %v1502_v28 = vadd.f32 %v2283_v27, %v1851_v26 }
 0x4e9   : > { %v1496_v32 = vpop.f32.mrf.mxu0 }
 0x4ea   : > { %v1497_v33 = vadd.f32 %v1851_v26, %v1496_v32  ;;  %v1516_v36 = vmax.f32 %v1502_v28, 0.0 }
 0x4eb   : > { %v2286_v34 = vpop.f32.mrf.mxu0 }
 0x4ec   : > { %v1515_v35 = vmax.f32 %v1497_v33, 0.0  ;;  %v1512_v37 = vadd.f32 %v2286_v34, %v1851_v26 }
 0x4ed   : > { %v1506_v38 = vpop.f32.mrf.mxu0 }
 0x4ee   : > { %v1507_v39 = vadd.f32 %v1851_v26, %v1506_v38  ;;  %2319 = vmatprep.mubr.f32.mxu1 %v1515_v35  ;;  %v1518_v41 = vmax.f32 %v1512_v37, 0.0 }
 0x4ef   : > { %2320 = vmatmul.mubr.f32.vlgmr.msra.gmra.mxu1 %v1516_v36 }
 0x4f0   : > { %v1517_v40 = vmax.f32 %v1507_v39, 0.0 }
 0x4f2   : > { %2322 = vmatprep.mubr.f32.mxu1 %v1517_v40 }
 0x4f3   : > { %2323 = vmatmul.mubr.f32.gmra.mxu1 %v1518_v41 }
 0x5af   : > { %v2321_v43 = vpop.f32.mrf.mxu1 }
 0x5b0   : > { %v1614_v44 = vadd.f32 %v2321_v43, %v1852_v42 }
 0x5b1   : > { %v1608_v45 = vpop.f32.mrf.mxu1 }
 0x5b2   : > { %1628 = vst [vmem:[%s722_s28 + $0x8] sm:$0xff] %v1614_v44  ;;  %v1609_v46 = vadd.f32 %v1852_v42, %v1608_v45 }
 0x5b3   : > { %v2324_v4 = vpop.f32.mrf.mxu1 }
 0x5b4   : > { %1627 = vst [vmem:[%s722_s28] sm:$0xff] %v1609_v46  ;;  %v1624_v47 = vadd.f32 %v2324_v4, %v1852_v42 }
 0x5b5   : > { %v1618_v48 = vpop.f32.mrf.mxu1 }
 0x5b6   : > { %1630 = vst [vmem:[%s722_s28 + $0x18] sm:$0xff] %v1624_v47  ;;  %v1619_v49 = vadd.f32 %v1852_v42, %v1618_v48 }
 0x5b8   : > { %1629 = vst [vmem:[%s722_s28 + $0x10] sm:$0xff] %v1619_v49 }
 0x5b9   : > { %2746 = shalt.err (!%p2743_p10)
}
 0x5ba   : > { %s2747_s26 = scalar_lea.hbm %s3279_s16, 512  ;;  %s2751_s10 = scalar_lea.hbm %s3401_s22, 1024 }
 0x5bb   : > { %p2748_p0 = scmp.ne.s32.totalorder %s3279_s16, %s2747_s26  ;;  %p2752_p9 = scmp.lt.s32.totalorder %s3279_s16, %s3401_s22 }
 0x5bc   : > { %p2753_p12 = scmp.lt.s32.totalorder %s2751_s10, %s2747_s26 }
 0x5bd   : > { %p2749_p2 = pnand %p2748_p0, %p3402_p4 }
 0x5be   : > { %p2754_p13 = por %p2753_p12, %p2752_p9 }
 0x5bf   : > { %p2750_p5 = pneg %p2749_p2 }
 0x5c1   : > { %p2755_p1 = pnand %p2754_p13, %p2750_p5 }
 0x5c3   : > { %2758 = shalt.err (!%p2755_p1)
}
 0x5c4   : > { %s2836_s28 = smov 128   ;;  %s2837_s1 = smov 8  }
 0x5c5   : > { %2361 = dma.vmem_to_hbm [thread:$0]  (%p3402_p4), %s3274_s23, 512, %s3279_s16, %s1632_s20, %s2836_s28, %s2836_s28, %s2837_s1  }
 0x5c6 PF: > { %s1660_s17 = sand.u32 1, %s2809_s24   ;;  %p3403_p8 = scmp.ne.s32.totalorder %s3383_s2, 0 }
 0x5c7   : > { %p3404_p11 = scmp.ge.s32.totalorder %s2821_s27, 2  ;;  %s1661_s13 = scalar_lea.sflag [#allocation4], %s1660_s17 }
 0x5c9   : > { %p2396_p3 = pnand %p3404_p11, %p3403_p8 }
 0x5cb   : > { %p2397_p7 = pneg %p2396_p3 }
 0x5cd   : > { %2804 = dma.done.wait (%p2397_p7), %s1661_s13, 512  }
 0x5ce   : > { %2806 = vsyncadd (%p2397_p7), %s1661_s13, 4294966784  ;;  %s3405_s27 = sld [smem:[#allocation29_spill]]  ;;  %s3408_s24 = smov %s2813_s25 }
 0x5cf   : > { %s3406_s19 = sld [smem:[#allocation28_spill]] }
 0x5d0   : > { %s3407_s26 = sld [smem:[#allocation30_spill]] }
 0x5d4   : > { %p37_p6 = scmp.ge.s32.totalorder %s3405_s27, 4  }
 0x5d5   : > { %s3409_s25 = smov %s3406_s19 }
 0x5d6   :  { %39 = sbr.rel (!%p37_p6) target bundleno = 24 (0x18), region = 178 }
 0x5db   :  { %1666 = vsyncpa [#allocation3], 1 }
 0x5dc   :  { %1668 = vsyncpa [#allocation3 + $0x1], 1 }
 0x5dd   :  { %1669 = vsyncpa [#allocation6], 1 }
 0x5de   :  { %1671 = vsyncpa [#allocation6 + $0x1], 1 }
 0x5df   :  { %1672 = vsyncpa [#allocation9], 1 }
 0x5e0   :  { %1673 = vsyncpa [#allocation12], 1 }
 0x5e1   :  { %1674 = vsyncpa [#allocation15], 1 }
 0x5e2   :  { %1675 = vsyncpa [#allocation18], 1 }
 0x5e3   :  { %1676 = vsyncpa [#allocation4], 1 }
 0x5e4   :  { %1678 = vsyncpa [#allocation4 + $0x1], 1 }

</bundles_post_ra>
